<compile_context>
chip_gen: v7x
topology: tpu7x:2x2x1
jax: 0.10.0
libtpu: 0.0.40
codegen_flags: <defaults>
</compile_context>

<pallas_src>
import functools
import math
from collections import OrderedDict

import jax
import jax.numpy as jnp
from jax import lax
from jax.experimental import pallas as pl
from jax.experimental.pallas import tpu as pltpu
from jax.scipy.special import gammaln

LANES = 128
SUBLANES = 8
N_LIVE = 25                      # number of accumulated scalar quantities
PX_THRESH = 3.0                  # Criterion(threshold=3)
EPS = 1e-6
HALF_LOG_PI = 0.5 * math.log(math.pi)
DEFAULT_TILE_ROWS = 1024


def _fold8(x):
    """(T,128) f32 -> (8,128) partial sums over groups of 8 sublanes (VPU vreg adds only)."""
    t = x.shape[0]
    return jnp.sum(x.reshape(t // SUBLANES, SUBLANES, LANES), axis=0)


def _lgamma_diff(a):
    """lgamma(a) - lgamma(a+0.5) for a > 0 (no lgamma lowering in Mosaic).

    Two recurrence steps push the argument to x = a+2 >= 2 where a Stirling
    expansion of the *difference* is accurate to ~5e-6 absolute for all a > 0."""
    x = a + 2.0
    xh = x + 0.5
    r = 1.0 / (x * xh)
    # 1/(12x) - 1/(12xh) = r/24 ;  1/x^3 - 1/xh^3 = 0.5*(x^2 + x*xh + xh^2)*r^3
    cubic = 0.5 * (x * x + x * xh + xh * xh) * (r * r * r)
    f = ((x - 0.5) * jnp.log(x) - x * jnp.log(xh) + 0.5
         + r * (1.0 / 24.0) - cubic * (1.0 / 360.0))
    # recurrence: lgamma(a)-lgamma(a+0.5) = f(a+2) + log((a+0.5)(a+1.5)) - log(a(a+1))
    return f + jnp.log((a + 0.5) * (a + 1.5)) - jnp.log(a * (a + 1.0))


def _criterion_kernel(disp_ref, occ_ref, resp_ref, plow_ref, opred_ref,
                      u0, la0, al0, be0,
                      u1, la1, al1, be1,
                      u2, la2, al2, be2,
                      out_ref, *, valid_rows):
    """Masked reductions for all losses/metrics over one pixel tile.

    out_ref: (N_LIVE, 8, 128) per-core accumulator slab, resident across the
    reduction grid axis (axis 1)."""
    core = pl.program_id(0)
    step = pl.program_id(1)

    @pl.when(step == 0)
    def _():
        out_ref[...] = jnp.zeros_like(out_ref)

    tile_rows = disp_ref.shape[0]
    block_idx = 2 * step + core                       # unclamped: overflow tile masks to zero
    row0 = block_idx * tile_rows
    iota = lax.broadcasted_iota(jnp.int32, (tile_rows, LANES), 0)
    inb = (row0 + iota) < valid_rows                  # masks partial-block garbage rows

    f32 = lambda ref: ref[...].astype(jnp.float32)    # planes may arrive as bf16

    disp = f32(disp_ref)
    valid = jnp.logical_and(disp > 0.0, inb)          # ~invalid_mask (validation_max_disp == -1)
    occb = jnp.logical_and(f32(occ_ref) > 0.5, inb)
    disp_scaled = 0.05 * disp                         # hoisted for D1 (|disp| == disp when valid)

    slot = iter(range(N_LIVE))

    def emit(vals):                                   # accumulate one (8,128) partial
        out_ref[next(slot)] += vals

    def msum(term, mask=None):                        # masked sum: select, never mask*term
        m = valid if mask is None else mask
        return _fold8(jnp.where(m, term, 0.0))

    def csum(mask):                                   # boolean count
        return _fold8(mask.astype(jnp.float32))

    emit(csum(valid))                                                 # 0  valid-pixel count
    emit(msum(-jnp.log(f32(resp_ref) + EPS)))                         # 1  rr sum
    z = f32(plow_ref) - disp
    az = jnp.abs(z)
    emit(msum(jnp.where(az < 1.0, 0.5 * z * z, az - 0.5)))            # 2  smooth-L1 sum
    opred = f32(opred_ref)
    emit(csum(occb))                                                  # 3  occ count
    emit(msum(-jnp.log(opred + EPS), occb))                           # 4  BE occluded sum
    emit(msum(-jnp.log(1.0 - opred + EPS)))                           # 5  BE non-occluded sum
    pm = opred > 0.5
    npm = jnp.logical_not(pm)
    emit(csum(jnp.logical_and(pm, occb)))                             # 6  inter_occ
    emit(csum(jnp.logical_or(jnp.logical_and(pm, valid), occb)))      # 7  union_occ
    emit(csum(jnp.logical_and(npm, valid)))                           # 8  inter_noc
    emit(csum(jnp.logical_or(jnp.logical_and(npm, occb), valid)))     # 9  union_noc

    for u_ref, la_ref, al_ref, be_ref in ((u0, la0, al0, be0),
                                          (u1, la1, al1, be1),
                                          (u2, la2, al2, be2)):
        u, la, al, be = f32(u_ref), f32(la_ref), f32(al_ref), f32(be_ref)
        diff = u - disp
        adiff = jnp.abs(diff)
        om = 2.0 * be * (1.0 + la)
        nll = (HALF_LOG_PI - 0.5 * jnp.log(la) - al * jnp.log(om)
               + (al + 0.5) * jnp.log(la * diff * diff + om) + _lgamma_diff(al))
        emit(msum(nll))                                               # 10+5b NIG NLL sum
        emit(msum(adiff * (2.0 * la + al)))                           # 11+5b regularizer sum
        px = adiff > PX_THRESH
        emit(csum(jnp.logical_and(px, valid)))                        # 12+5b px-error count
        emit(msum(adiff))                                             # 13+5b EPE sum
        gt3 = adiff > 3.0                                             # == px when threshold==3 (CSE)
        d1 = jnp.logical_and(gt3, adiff > disp_scaled)
        emit(csum(jnp.logical_and(d1, valid)))                        # 14+5b D1 count


def _run_kernel(planes, *, tile_rows):
    """planes: list of 17 (R, 128) float planes. Returns (N_LIVE,) f32 scalar sums."""
    r = planes[0].shape[0]
    num_blocks = -(-r // tile_rows)
    steps = -(-num_blocks // 2)

    def pix_map(c, i):
        # interleaved megacore split; clamp keeps the DMA in bounds, the kernel's
        # unclamped row mask zeroes any duplicated / overflow tile.
        return (jnp.minimum(2 * i + c, num_blocks - 1), 0)

    pix_spec = pl.BlockSpec((tile_rows, LANES), pix_map)

    out = pl.pallas_call(
        functools.partial(_criterion_kernel, valid_rows=r),
        out_shape=jax.ShapeDtypeStruct((2 * N_LIVE, SUBLANES, LANES), jnp.float32),
        grid_spec=pltpu.PrefetchScalarGridSpec(
            num_scalar_prefetch=0,
            grid=(2, steps),
            in_specs=[pix_spec] * 17,
            out_specs=pl.BlockSpec((N_LIVE, SUBLANES, LANES), lambda c, i: (c, 0, 0)),
        ),
        compiler_params=pltpu.CompilerParams(
            dimension_semantics=("parallel", "arbitrary"),
            vmem_limit_bytes=40 * 1024 * 1024,   # 17 f32 planes x 2 bufs @ 1024 rows ~ 17 MiB
        ),
    )(*planes)

    # tiny epilogue: reduce the two core slabs and the (8, 128) partials
    partial = jnp.sum(out, axis=(1, 2))              # (2 * N_LIVE,)
    return jnp.sum(partial.reshape(2, N_LIVE), axis=0)


def _choose_tile_rows(r):
    """Largest tile (<= DEFAULT_TILE_ROWS) that still gives both cores work.
    `r` is a multiple of SUBLANES, so every returned value is sublane-aligned
    (or equals the full row extent)."""
    if r <= SUBLANES:
        return r
    half8 = ((r + 1) // 2 + SUBLANES - 1) // SUBLANES * SUBLANES
    if half8 >= r:
        return r
    return min(DEFAULT_TILE_ROWS, half8)


def criterion_forward(inputs, outputs, *, loss_weight, weight_reg=0.05):
    """JAX/Pallas equivalent of Criterion.forward (threshold=3, validation_max_disp=-1)."""
    disp_raw = jnp.asarray(inputs["disp"])
    pix = disp_raw.size
    align = SUBLANES * LANES
    pix_pad = -(-pix // align) * align
    pad = pix_pad - pix
    r = pix_pad // LANES
    tile_rows = _choose_tile_rows(r)

    def prep(x):
        # No copy in the common case (pixel count already 8*128-aligned): ravel /
        # reshape are free views.  Planes keep their incoming dtype (f32 or bf16)
        # and are upcast in-kernel, so bf16 activations halve HBM read traffic.
        v = jnp.asarray(x)
        if v.dtype == jnp.bool_:
            v = v.astype(jnp.float32)
        v = v.reshape(-1)
        if pad:
            v = jnp.pad(v, (0, pad))     # rare tail-only pad; disp=0 / occ=0 -> masked out
        return v.reshape(r, LANES)

    planes = [prep(disp_raw),                         # disp
              prep(inputs["occ_mask"]),               # occlusion mask
              prep(outputs["gt_response"]),           # gt response
              prep(outputs["disp_pred_low_res"]),     # low-res disparity pred
              prep(outputs["occ_pred"])]              # occlusion pred
    for tag in ("", "_pcw", "_combine"):
        dkey = "disp_pred" if tag == "" else "disp" + tag
        planes += [prep(outputs[dkey]), prep(outputs["la" + tag]),
                   prep(outputs["alpha" + tag]), prep(outputs["beta" + tag])]

    sums = _run_kernel(planes, tile_rows=tile_rows)

    cnt = sums[0]
    # TODO(synk): the PyTorch module returns None when torch.all(invalid_mask); that
    # host-side early exit (and the optional gt_response_occ_left/right concat) is
    # left to the caller since it is data-dependent Python control flow.
    loss = OrderedDict()
    loss["rr"] = sums[1] / cnt
    loss["l1_raw"] = sums[2] / cnt
    lkeys = ("l1", "l1_pcw", "l1_combine")
    for b in range(3):
        base = 10 + 5 * b
        loss[lkeys[b]] = sums[base] / cnt + weight_reg * sums[base + 1] / cnt
    loss["occ_be"] = (sums[4] + sums[5]) / (sums[3] + cnt)

    agg = 0.0
    for k in ("rr", "l1_raw", "l1", "l1_pcw", "l1_combine", "occ_be"):
        agg = agg + loss[k] * loss_weight[k]
    loss["aggregated"] = agg

    def add_metrics(b, nm):
        base = 10 + 5 * b
        loss["error_px" + nm] = sums[base + 2]     # Thres_metric: count of |err| > threshold
        loss["total_px" + nm] = cnt                # number of valid pixels
        loss["epe" + nm] = sums[base + 3] / cnt    # EPE_metric: mean |err| over valid
        loss["D1" + nm] = sums[base + 4] / cnt     # D1_metric: mean of (err>3 & err>0.05*gt)

    add_metrics(0, "")
    loss["iou"] = (sums[6] + sums[8]) / (sums[7] + sums[9])
    add_metrics(1, "_pcw")
    add_metrics(2, "_combine")
    return loss


# ---------------- pure-JAX reference (correctness check only) ----------------
def reference_forward(inputs, outputs, loss_weight, weight_reg=0.05, px_thresh=3.0):
    f32 = lambda x: jnp.asarray(x, jnp.float32).ravel()
    disp = f32(inputs["disp"])
    occ = jnp.asarray(inputs["occ_mask"]).ravel()
    valid = disp > 0.0
    cntf = jnp.sum(valid.astype(jnp.float32))
    msum = lambda x, m: jnp.sum(jnp.where(m, x, 0.0))
    mmean = lambda x, m: msum(x, m) / jnp.sum(m.astype(jnp.float32))
    eps = 1e-6
    loss = {}
    loss["rr"] = mmean(-jnp.log(f32(outputs["gt_response"]) + eps), valid)
    z = f32(outputs["disp_pred_low_res"]) - disp
    az = jnp.abs(z)
    loss["l1_raw"] = mmean(jnp.where(az < 1.0, 0.5 * z * z, az - 0.5), valid)
    for tag, lk in (("", "l1"), ("_pcw", "l1_pcw"), ("_combine", "l1_combine")):
        dk = "disp_pred" if tag == "" else "disp" + tag
        u, la = f32(outputs[dk]), f32(outputs["la" + tag])
        al, be = f32(outputs["alpha" + tag]), f32(outputs["beta" + tag])
        om = 2.0 * be * (1.0 + la)
        nll = (0.5 * jnp.log(math.pi / la) - al * jnp.log(om)
               + (al + 0.5) * jnp.log(la * (u - disp) ** 2 + om)
               + gammaln(al) - gammaln(al + 0.5))
        loss[lk] = (msum(nll, valid) / cntf
                    + weight_reg * msum(jnp.abs(u - disp) * (2.0 * la + al), valid) / cntf)
    opred = f32(outputs["occ_pred"])
    loss["occ_be"] = ((msum(-jnp.log(opred + eps), occ)
                       + msum(-jnp.log(1.0 - opred + eps), valid))
                      / (jnp.sum(occ.astype(jnp.float32)) + cntf))
    loss["aggregated"] = sum(loss[k] * loss_weight[k]
                             for k in ("rr", "l1_raw", "l1", "l1_pcw", "l1_combine", "occ_be"))
    for tag, nm in (("", ""), ("_pcw", "_pcw"), ("_combine", "_combine")):
        dk = "disp_pred" if tag == "" else "disp" + tag
        e = jnp.abs(f32(outputs[dk]) - disp)
        loss["error_px" + nm] = msum((e > px_thresh).astype(jnp.float32), valid)
        loss["total_px" + nm] = cntf
        loss["epe" + nm] = mmean(e, valid)
        loss["D1" + nm] = mmean(((e > 3.0) & (e > 0.05 * jnp.abs(disp))).astype(jnp.float32), valid)
    pm = opred > 0.5
    inter_occ = jnp.sum((pm & occ).astype(jnp.float32))
    union_occ = jnp.sum(((pm & valid) | occ).astype(jnp.float32))
    inter_noc = jnp.sum(((~pm) & valid).astype(jnp.float32))
    union_noc = jnp.sum((((~pm) & occ) | valid).astype(jnp.float32))
    loss["iou"] = (inter_occ + inter_noc) / (union_occ + union_noc)
    return loss


if __name__ == "__main__":
    key = jax.random.PRNGKey(0)
    N, H, W = 2, 16, 64                      # N*H*W = 2048 pixels -> (16, 128), no padding
    ks = jax.random.split(key, 20)

    disp = jax.random.uniform(ks[0], (N, H, W), minval=-5.0, maxval=40.0)   # <=0 -> invalid
    occ_mask = jax.random.uniform(ks[1], (N, H, W)) < 0.2
    inputs = {"disp": disp, "occ_mask": occ_mask}

    outputs = {
        "gt_response": jax.random.uniform(ks[2], (N, H, W), minval=0.01, maxval=0.99),
        "disp_pred_low_res": disp + jax.random.normal(ks[3], (N, H, W)),
        "occ_pred": jax.random.uniform(ks[4], (N, H, W), minval=0.01, maxval=0.99),
    }
    kidx = 5
    for tag in ("", "_pcw", "_combine"):
        dkey = "disp_pred" if tag == "" else "disp" + tag
        outputs[dkey] = disp + 2.0 * jax.random.normal(ks[kidx], (N, H, W)); kidx += 1
        outputs["la" + tag] = jax.random.uniform(ks[kidx], (N, H, W), minval=0.1, maxval=2.0); kidx += 1
        outputs["alpha" + tag] = jax.random.uniform(ks[kidx], (N, H, W), minval=1.0, maxval=3.0); kidx += 1
        outputs["beta" + tag] = jax.random.uniform(ks[kidx], (N, H, W), minval=0.1, maxval=2.0); kidx += 1

    # deterministic loss weights (the module's `loss_weight` dict)
    loss_weight = {"rr": 1.0, "l1_raw": 1.0, "l1": 1.0,
                   "l1_pcw": 1.0, "l1_combine": 1.0, "occ_be": 1.0}

    loss = criterion_forward(inputs, outputs, loss_weight=loss_weight, weight_reg=0.05)
    jax.block_until_ready(loss["aggregated"])

    ref = reference_forward(inputs, outputs, loss_weight, weight_reg=0.05)
    for k in ref:
        ok = jnp.allclose(loss[k], ref[k], rtol=5e-3, atol=5e-3)
        assert bool(ok), (k, float(loss[k]), float(ref[k]))

    print("KERNEL_OK")
</pallas_src>

<mosaic_0001>
module attributes {stable_mosaic.version = 11 : i64} {
  func.func @_criterion_kernel(%arg0: i32, %arg1: i32, %arg2: memref<8x128xf32, #tpu.memory_space<vmem>>, %arg3: memref<8x128xf32, #tpu.memory_space<vmem>>, %arg4: memref<8x128xf32, #tpu.memory_space<vmem>>, %arg5: memref<8x128xf32, #tpu.memory_space<vmem>>, %arg6: memref<8x128xf32, #tpu.memory_space<vmem>>, %arg7: memref<8x128xf32, #tpu.memory_space<vmem>>, %arg8: memref<8x128xf32, #tpu.memory_space<vmem>>, %arg9: memref<8x128xf32, #tpu.memory_space<vmem>>, %arg10: memref<8x128xf32, #tpu.memory_space<vmem>>, %arg11: memref<8x128xf32, #tpu.memory_space<vmem>>, %arg12: memref<8x128xf32, #tpu.memory_space<vmem>>, %arg13: memref<8x128xf32, #tpu.memory_space<vmem>>, %arg14: memref<8x128xf32, #tpu.memory_space<vmem>>, %arg15: memref<8x128xf32, #tpu.memory_space<vmem>>, %arg16: memref<8x128xf32, #tpu.memory_space<vmem>>, %arg17: memref<8x128xf32, #tpu.memory_space<vmem>>, %arg18: memref<8x128xf32, #tpu.memory_space<vmem>>, %arg19: memref<25x8x128xf32, #tpu.memory_space<vmem>>) attributes {dimension_semantics = [#tpu.dimension_semantics<parallel>, #tpu.dimension_semantics<arbitrary>], iteration_bounds = array<i64: 2, 1>, scalar_prefetch = 0 : i64, scratch_operands = 0 : i64, tpu.core_type = #tpu.core_type<tc>, window_params = [{transform_indices = @transform_0, window_bounds = array<i64: 8, 128>}, {transform_indices = @transform_1, window_bounds = array<i64: 8, 128>}, {transform_indices = @transform_2, window_bounds = array<i64: 8, 128>}, {transform_indices = @transform_3, window_bounds = array<i64: 8, 128>}, {transform_indices = @transform_4, window_bounds = array<i64: 8, 128>}, {transform_indices = @transform_5, window_bounds = array<i64: 8, 128>}, {transform_indices = @transform_6, window_bounds = array<i64: 8, 128>}, {transform_indices = @transform_7, window_bounds = array<i64: 8, 128>}, {transform_indices = @transform_8, window_bounds = array<i64: 8, 128>}, {transform_indices = @transform_9, window_bounds = array<i64: 8, 128>}, {transform_indices = @transform_10, window_bounds = array<i64: 8, 128>}, {transform_indices = @transform_11, window_bounds = array<i64: 8, 128>}, {transform_indices = @transform_12, window_bounds = array<i64: 8, 128>}, {transform_indices = @transform_13, window_bounds = array<i64: 8, 128>}, {transform_indices = @transform_14, window_bounds = array<i64: 8, 128>}, {transform_indices = @transform_15, window_bounds = array<i64: 8, 128>}, {transform_indices = @transform_16, window_bounds = array<i64: 8, 128>}, {transform_indices = @transform_17, window_bounds = array<i64: 25, 8, 128>}]} {
    %c0_i32 = arith.constant 0 : i32
    %0 = arith.cmpi eq, %arg1, %c0_i32 : i32
    %1 = arith.extui %0 : i1 to i32
    %c0_i32_0 = arith.constant 0 : i32
    %2 = arith.cmpi ne, %1, %c0_i32_0 : i32
    scf.if %2 {
      %cst_269 = arith.constant 0.000000e+00 : f32
      %562 = vector.broadcast %cst_269 : f32 to vector<25x8x128xf32>
      %c0_270 = arith.constant 0 : index
      %c0_271 = arith.constant 0 : index
      %c0_272 = arith.constant 0 : index
      %563 = vector.load %arg19[%c0_270, %c0_271, %c0_272] : memref<25x8x128xf32, #tpu.memory_space<vmem>>, vector<25x8x128xf32>
      tpu.vector_store %arg19[%c0_270, %c0_271, %c0_272], %562 {strides = array<i32>} : memref<25x8x128xf32, #tpu.memory_space<vmem>>, vector<25x8x128xf32>,
    } else {
    }
    %c2_i32 = arith.constant 2 : i32
    %3 = arith.muli %c2_i32, %arg1 : i32
    %4 = arith.addi %3, %arg0 : i32
    %c8_i32 = arith.constant 8 : i32
    %5 = arith.muli %4, %c8_i32 : i32
    %6 = tpu.iota {dimensions = array<i32: 0>} : vector<8x128xi32>
    %7 = vector.broadcast %5 : i32 to vector<8x128xi32>
    %8 = arith.addi %7, %6 : vector<8x128xi32>
    %c16_i32 = arith.constant 16 : i32
    %9 = vector.broadcast %c16_i32 : i32 to vector<8x128xi32>
    %10 = arith.cmpi slt, %8, %9 : vector<8x128xi32>
    %c0 = arith.constant 0 : index
    %c0_1 = arith.constant 0 : index
    %11 = vector.load %arg2[%c0, %c0_1] : memref<8x128xf32, #tpu.memory_space<vmem>>, vector<8x128xf32>
    %cst = arith.constant 0.000000e+00 : f32
    %12 = vector.broadcast %cst : f32 to vector<8x128xf32>
    %13 = arith.cmpf ogt, %11, %12 : vector<8x128xf32>
    %14 = arith.andi %13, %10 : vector<8x128xi1>
    %c0_2 = arith.constant 0 : index
    %c0_3 = arith.constant 0 : index
    %15 = vector.load %arg3[%c0_2, %c0_3] : memref<8x128xf32, #tpu.memory_space<vmem>>, vector<8x128xf32>
    %cst_4 = arith.constant 5.000000e-01 : f32
    %16 = vector.broadcast %cst_4 : f32 to vector<8x128xf32>
    %17 = arith.cmpf ogt, %15, %16 : vector<8x128xf32>
    %18 = arith.andi %17, %10 : vector<8x128xi1>
    %cst_5 = arith.constant 5.000000e-02 : f32
    %19 = vector.broadcast %cst_5 : f32 to vector<8x128xf32>
    %20 = arith.mulf %19, %11 : vector<8x128xf32>
    %21 = arith.extui %14 : vector<8x128xi1> to vector<8x128xi32>
    %22 = arith.sitofp %21 : vector<8x128xi32> to vector<8x128xf32>
    %23 = vector.shape_cast %22 : vector<8x128xf32> to vector<1x8x128xf32>
    %cst_6 = arith.constant dense<0.000000e+00> : vector<8x128xf32>
    %24 = vector.multi_reduction <add>, %23, %cst_6 [0] : vector<1x8x128xf32> to vector<8x128xf32>
    %c0_7 = arith.constant 0 : index
    %c0_8 = arith.constant 0 : index
    %c0_9 = arith.constant 0 : index
    %25 = vector.load %arg19[%c0_7, %c0_8, %c0_9] : memref<25x8x128xf32, #tpu.memory_space<vmem>>, vector<1x8x128xf32>
    %26 = vector.shape_cast %25 : vector<1x8x128xf32> to vector<8x128xf32>
    %27 = arith.addf %26, %24 : vector<8x128xf32>
    %c0_10 = arith.constant 0 : index
    %c0_11 = arith.constant 0 : index
    %c0_12 = arith.constant 0 : index
    %28 = vector.load %arg19[%c0_10, %c0_11, %c0_12] : memref<25x8x128xf32, #tpu.memory_space<vmem>>, vector<1x8x128xf32>
    %29 = vector.shape_cast %28 : vector<1x8x128xf32> to vector<8x128xf32>
    %30 = vector.shape_cast %27 : vector<8x128xf32> to vector<1x8x128xf32>
    tpu.vector_store %arg19[%c0_10, %c0_11, %c0_12], %30 {strides = array<i32>} : memref<25x8x128xf32, #tpu.memory_space<vmem>>, vector<1x8x128xf32>,
    %c0_13 = arith.constant 0 : index
    %c0_14 = arith.constant 0 : index
    %31 = vector.load %arg4[%c0_13, %c0_14] : memref<8x128xf32, #tpu.memory_space<vmem>>, vector<8x128xf32>
    %cst_15 = arith.constant 9.99999997E-7 : f32
    %32 = vector.broadcast %cst_15 : f32 to vector<8x128xf32>
    %33 = arith.addf %31, %32 : vector<8x128xf32>
    %34 = math.log %33 : vector<8x128xf32>
    %cst_16 = arith.constant 0.000000e+00 : f32
    %35 = vector.broadcast %cst_16 : f32 to vector<8x128xf32>
    %36 = arith.subf %35, %34 : vector<8x128xf32>
    %cst_17 = arith.constant 0.000000e+00 : f32
    %37 = vector.broadcast %cst_17 : f32 to vector<8x128xf32>
    %38 = arith.select %14, %36, %37 : vector<8x128xi1>, vector<8x128xf32>
    %39 = vector.shape_cast %38 : vector<8x128xf32> to vector<1x8x128xf32>
    %cst_18 = arith.constant dense<0.000000e+00> : vector<8x128xf32>
    %40 = vector.multi_reduction <add>, %39, %cst_18 [0] : vector<1x8x128xf32> to vector<8x128xf32>
    %c1 = arith.constant 1 : index
    %c0_19 = arith.constant 0 : index
    %c0_20 = arith.constant 0 : index
    %41 = vector.load %arg19[%c1, %c0_19, %c0_20] : memref<25x8x128xf32, #tpu.memory_space<vmem>>, vector<1x8x128xf32>
    %42 = vector.shape_cast %41 : vector<1x8x128xf32> to vector<8x128xf32>
    %43 = arith.addf %42, %40 : vector<8x128xf32>
    %c1_21 = arith.constant 1 : index
    %c0_22 = arith.constant 0 : index
    %c0_23 = arith.constant 0 : index
    %44 = vector.load %arg19[%c1_21, %c0_22, %c0_23] : memref<25x8x128xf32, #tpu.memory_space<vmem>>, vector<1x8x128xf32>
    %45 = vector.shape_cast %44 : vector<1x8x128xf32> to vector<8x128xf32>
    %46 = vector.shape_cast %43 : vector<8x128xf32> to vector<1x8x128xf32>
    tpu.vector_store %arg19[%c1_21, %c0_22, %c0_23], %46 {strides = array<i32>} : memref<25x8x128xf32, #tpu.memory_space<vmem>>, vector<1x8x128xf32>,
    %c0_24 = arith.constant 0 : index
    %c0_25 = arith.constant 0 : index
    %47 = vector.load %arg5[%c0_24, %c0_25] : memref<8x128xf32, #tpu.memory_space<vmem>>, vector<8x128xf32>
    %48 = arith.subf %47, %11 : vector<8x128xf32>
    %49 = math.absf %48 : vector<8x128xf32>
    %cst_26 = arith.constant 1.000000e+00 : f32
    %50 = vector.broadcast %cst_26 : f32 to vector<8x128xf32>
    %51 = arith.cmpf olt, %49, %50 : vector<8x128xf32>
    %cst_27 = arith.constant 5.000000e-01 : f32
    %52 = vector.broadcast %cst_27 : f32 to vector<8x128xf32>
    %53 = arith.mulf %52, %48 : vector<8x128xf32>
    %54 = arith.mulf %53, %48 : vector<8x128xf32>
    %cst_28 = arith.constant 5.000000e-01 : f32
    %55 = vector.broadcast %cst_28 : f32 to vector<8x128xf32>
    %56 = arith.subf %49, %55 : vector<8x128xf32>
    %57 = arith.select %51, %54, %56 : vector<8x128xi1>, vector<8x128xf32>
    %cst_29 = arith.constant 0.000000e+00 : f32
    %58 = vector.broadcast %cst_29 : f32 to vector<8x128xf32>
    %59 = arith.select %14, %57, %58 : vector<8x128xi1>, vector<8x128xf32>
    %60 = vector.shape_cast %59 : vector<8x128xf32> to vector<1x8x128xf32>
    %cst_30 = arith.constant dense<0.000000e+00> : vector<8x128xf32>
    %61 = vector.multi_reduction <add>, %60, %cst_30 [0] : vector<1x8x128xf32> to vector<8x128xf32>
    %c2 = arith.constant 2 : index
    %c0_31 = arith.constant 0 : index
    %c0_32 = arith.constant 0 : index
    %62 = vector.load %arg19[%c2, %c0_31, %c0_32] : memref<25x8x128xf32, #tpu.memory_space<vmem>>, vector<1x8x128xf32>
    %63 = vector.shape_cast %62 : vector<1x8x128xf32> to vector<8x128xf32>
    %64 = arith.addf %63, %61 : vector<8x128xf32>
    %c2_33 = arith.constant 2 : index
    %c0_34 = arith.constant 0 : index
    %c0_35 = arith.constant 0 : index
    %65 = vector.load %arg19[%c2_33, %c0_34, %c0_35] : memref<25x8x128xf32, #tpu.memory_space<vmem>>, vector<1x8x128xf32>
    %66 = vector.shape_cast %65 : vector<1x8x128xf32> to vector<8x128xf32>
    %67 = vector.shape_cast %64 : vector<8x128xf32> to vector<1x8x128xf32>
    tpu.vector_store %arg19[%c2_33, %c0_34, %c0_35], %67 {strides = array<i32>} : memref<25x8x128xf32, #tpu.memory_space<vmem>>, vector<1x8x128xf32>,
    %c0_36 = arith.constant 0 : index
    %c0_37 = arith.constant 0 : index
    %68 = vector.load %arg6[%c0_36, %c0_37] : memref<8x128xf32, #tpu.memory_space<vmem>>, vector<8x128xf32>
    %69 = arith.extui %18 : vector<8x128xi1> to vector<8x128xi32>
    %70 = arith.sitofp %69 : vector<8x128xi32> to vector<8x128xf32>
    %71 = vector.shape_cast %70 : vector<8x128xf32> to vector<1x8x128xf32>
    %cst_38 = arith.constant dense<0.000000e+00> : vector<8x128xf32>
    %72 = vector.multi_reduction <add>, %71, %cst_38 [0] : vector<1x8x128xf32> to vector<8x128xf32>
    %c3 = arith.constant 3 : index
    %c0_39 = arith.constant 0 : index
    %c0_40 = arith.constant 0 : index
    %73 = vector.load %arg19[%c3, %c0_39, %c0_40] : memref<25x8x128xf32, #tpu.memory_space<vmem>>, vector<1x8x128xf32>
    %74 = vector.shape_cast %73 : vector<1x8x128xf32> to vector<8x128xf32>
    %75 = arith.addf %74, %72 : vector<8x128xf32>
    %c3_41 = arith.constant 3 : index
    %c0_42 = arith.constant 0 : index
    %c0_43 = arith.constant 0 : index
    %76 = vector.load %arg19[%c3_41, %c0_42, %c0_43] : memref<25x8x128xf32, #tpu.memory_space<vmem>>, vector<1x8x128xf32>
    %77 = vector.shape_cast %76 : vector<1x8x128xf32> to vector<8x128xf32>
    %78 = vector.shape_cast %75 : vector<8x128xf32> to vector<1x8x128xf32>
    tpu.vector_store %arg19[%c3_41, %c0_42, %c0_43], %78 {strides = array<i32>} : memref<25x8x128xf32, #tpu.memory_space<vmem>>, vector<1x8x128xf32>,
    %cst_44 = arith.constant 9.99999997E-7 : f32
    %79 = vector.broadcast %cst_44 : f32 to vector<8x128xf32>
    %80 = arith.addf %68, %79 : vector<8x128xf32>
    %81 = math.log %80 : vector<8x128xf32>
    %cst_45 = arith.constant 0.000000e+00 : f32
    %82 = vector.broadcast %cst_45 : f32 to vector<8x128xf32>
    %83 = arith.subf %82, %81 : vector<8x128xf32>
    %cst_46 = arith.constant 0.000000e+00 : f32
    %84 = vector.broadcast %cst_46 : f32 to vector<8x128xf32>
    %85 = arith.select %18, %83, %84 : vector<8x128xi1>, vector<8x128xf32>
    %86 = vector.shape_cast %85 : vector<8x128xf32> to vector<1x8x128xf32>
    %cst_47 = arith.constant dense<0.000000e+00> : vector<8x128xf32>
    %87 = vector.multi_reduction <add>, %86, %cst_47 [0] : vector<1x8x128xf32> to vector<8x128xf32>
    %c4 = arith.constant 4 : index
    %c0_48 = arith.constant 0 : index
    %c0_49 = arith.constant 0 : index
    %88 = vector.load %arg19[%c4, %c0_48, %c0_49] : memref<25x8x128xf32, #tpu.memory_space<vmem>>, vector<1x8x128xf32>
    %89 = vector.shape_cast %88 : vector<1x8x128xf32> to vector<8x128xf32>
    %90 = arith.addf %89, %87 : vector<8x128xf32>
    %c4_50 = arith.constant 4 : index
    %c0_51 = arith.constant 0 : index
    %c0_52 = arith.constant 0 : index
    %91 = vector.load %arg19[%c4_50, %c0_51, %c0_52] : memref<25x8x128xf32, #tpu.memory_space<vmem>>, vector<1x8x128xf32>
    %92 = vector.shape_cast %91 : vector<1x8x128xf32> to vector<8x128xf32>
    %93 = vector.shape_cast %90 : vector<8x128xf32> to vector<1x8x128xf32>
    tpu.vector_store %arg19[%c4_50, %c0_51, %c0_52], %93 {strides = array<i32>} : memref<25x8x128xf32, #tpu.memory_space<vmem>>, vector<1x8x128xf32>,
    %cst_53 = arith.constant 1.000000e+00 : f32
    %94 = vector.broadcast %cst_53 : f32 to vector<8x128xf32>
    %95 = arith.subf %94, %68 : vector<8x128xf32>
    %cst_54 = arith.constant 9.99999997E-7 : f32
    %96 = vector.broadcast %cst_54 : f32 to vector<8x128xf32>
    %97 = arith.addf %95, %96 : vector<8x128xf32>
    %98 = math.log %97 : vector<8x128xf32>
    %cst_55 = arith.constant 0.000000e+00 : f32
    %99 = vector.broadcast %cst_55 : f32 to vector<8x128xf32>
    %100 = arith.subf %99, %98 : vector<8x128xf32>
    %cst_56 = arith.constant 0.000000e+00 : f32
    %101 = vector.broadcast %cst_56 : f32 to vector<8x128xf32>
    %102 = arith.select %14, %100, %101 : vector<8x128xi1>, vector<8x128xf32>
    %103 = vector.shape_cast %102 : vector<8x128xf32> to vector<1x8x128xf32>
    %cst_57 = arith.constant dense<0.000000e+00> : vector<8x128xf32>
    %104 = vector.multi_reduction <add>, %103, %cst_57 [0] : vector<1x8x128xf32> to vector<8x128xf32>
    %c5 = arith.constant 5 : index
    %c0_58 = arith.constant 0 : index
    %c0_59 = arith.constant 0 : index
    %105 = vector.load %arg19[%c5, %c0_58, %c0_59] : memref<25x8x128xf32, #tpu.memory_space<vmem>>, vector<1x8x128xf32>
    %106 = vector.shape_cast %105 : vector<1x8x128xf32> to vector<8x128xf32>
    %107 = arith.addf %106, %104 : vector<8x128xf32>
    %c5_60 = arith.constant 5 : index
    %c0_61 = arith.constant 0 : index
    %c0_62 = arith.constant 0 : index
    %108 = vector.load %arg19[%c5_60, %c0_61, %c0_62] : memref<25x8x128xf32, #tpu.memory_space<vmem>>, vector<1x8x128xf32>
    %109 = vector.shape_cast %108 : vector<1x8x128xf32> to vector<8x128xf32>
    %110 = vector.shape_cast %107 : vector<8x128xf32> to vector<1x8x128xf32>
    tpu.vector_store %arg19[%c5_60, %c0_61, %c0_62], %110 {strides = array<i32>} : memref<25x8x128xf32, #tpu.memory_space<vmem>>, vector<1x8x128xf32>,
    %cst_63 = arith.constant 5.000000e-01 : f32
    %111 = vector.broadcast %cst_63 : f32 to vector<8x128xf32>
    %112 = arith.cmpf ogt, %68, %111 : vector<8x128xf32>
    %cst_64 = arith.constant dense<true> : vector<8x128xi1>
    %113 = arith.xori %112, %cst_64 : vector<8x128xi1>
    %114 = arith.andi %112, %18 : vector<8x128xi1>
    %115 = arith.extui %114 : vector<8x128xi1> to vector<8x128xi32>
    %116 = arith.sitofp %115 : vector<8x128xi32> to vector<8x128xf32>
    %117 = vector.shape_cast %116 : vector<8x128xf32> to vector<1x8x128xf32>
    %cst_65 = arith.constant dense<0.000000e+00> : vector<8x128xf32>
    %118 = vector.multi_reduction <add>, %117, %cst_65 [0] : vector<1x8x128xf32> to vector<8x128xf32>
    %c6 = arith.constant 6 : index
    %c0_66 = arith.constant 0 : index
    %c0_67 = arith.constant 0 : index
    %119 = vector.load %arg19[%c6, %c0_66, %c0_67] : memref<25x8x128xf32, #tpu.memory_space<vmem>>, vector<1x8x128xf32>
    %120 = vector.shape_cast %119 : vector<1x8x128xf32> to vector<8x128xf32>
    %121 = arith.addf %120, %118 : vector<8x128xf32>
    %c6_68 = arith.constant 6 : index
    %c0_69 = arith.constant 0 : index
    %c0_70 = arith.constant 0 : index
    %122 = vector.load %arg19[%c6_68, %c0_69, %c0_70] : memref<25x8x128xf32, #tpu.memory_space<vmem>>, vector<1x8x128xf32>
    %123 = vector.shape_cast %122 : vector<1x8x128xf32> to vector<8x128xf32>
    %124 = vector.shape_cast %121 : vector<8x128xf32> to vector<1x8x128xf32>
    tpu.vector_store %arg19[%c6_68, %c0_69, %c0_70], %124 {strides = array<i32>} : memref<25x8x128xf32, #tpu.memory_space<vmem>>, vector<1x8x128xf32>,
    %125 = arith.andi %112, %14 : vector<8x128xi1>
    %126 = arith.ori %125, %18 : vector<8x128xi1>
    %127 = arith.extui %126 : vector<8x128xi1> to vector<8x128xi32>
    %128 = arith.sitofp %127 : vector<8x128xi32> to vector<8x128xf32>
    %129 = vector.shape_cast %128 : vector<8x128xf32> to vector<1x8x128xf32>
    %cst_71 = arith.constant dense<0.000000e+00> : vector<8x128xf32>
    %130 = vector.multi_reduction <add>, %129, %cst_71 [0] : vector<1x8x128xf32> to vector<8x128xf32>
    %c7 = arith.constant 7 : index
    %c0_72 = arith.constant 0 : index
    %c0_73 = arith.constant 0 : index
    %131 = vector.load %arg19[%c7, %c0_72, %c0_73] : memref<25x8x128xf32, #tpu.memory_space<vmem>>, vector<1x8x128xf32>
    %132 = vector.shape_cast %131 : vector<1x8x128xf32> to vector<8x128xf32>
    %133 = arith.addf %132, %130 : vector<8x128xf32>
    %c7_74 = arith.constant 7 : index
    %c0_75 = arith.constant 0 : index
    %c0_76 = arith.constant 0 : index
    %134 = vector.load %arg19[%c7_74, %c0_75, %c0_76] : memref<25x8x128xf32, #tpu.memory_space<vmem>>, vector<1x8x128xf32>
    %135 = vector.shape_cast %134 : vector<1x8x128xf32> to vector<8x128xf32>
    %136 = vector.shape_cast %133 : vector<8x128xf32> to vector<1x8x128xf32>
    tpu.vector_store %arg19[%c7_74, %c0_75, %c0_76], %136 {strides = array<i32>} : memref<25x8x128xf32, #tpu.memory_space<vmem>>, vector<1x8x128xf32>,
    %137 = arith.andi %113, %14 : vector<8x128xi1>
    %138 = arith.extui %137 : vector<8x128xi1> to vector<8x128xi32>
    %139 = arith.sitofp %138 : vector<8x128xi32> to vector<8x128xf32>
    %140 = vector.shape_cast %139 : vector<8x128xf32> to vector<1x8x128xf32>
    %cst_77 = arith.constant dense<0.000000e+00> : vector<8x128xf32>
    %141 = vector.multi_reduction <add>, %140, %cst_77 [0] : vector<1x8x128xf32> to vector<8x128xf32>
    %c8 = arith.constant 8 : index
    %c0_78 = arith.constant 0 : index
    %c0_79 = arith.constant 0 : index
    %142 = vector.load %arg19[%c8, %c0_78, %c0_79] : memref<25x8x128xf32, #tpu.memory_space<vmem>>, vector<1x8x128xf32>
    %143 = vector.shape_cast %142 : vector<1x8x128xf32> to vector<8x128xf32>
    %144 = arith.addf %143, %141 : vector<8x128xf32>
    %c8_80 = arith.constant 8 : index
    %c0_81 = arith.constant 0 : index
    %c0_82 = arith.constant 0 : index
    %145 = vector.load %arg19[%c8_80, %c0_81, %c0_82] : memref<25x8x128xf32, #tpu.memory_space<vmem>>, vector<1x8x128xf32>
    %146 = vector.shape_cast %145 : vector<1x8x128xf32> to vector<8x128xf32>
    %147 = vector.shape_cast %144 : vector<8x128xf32> to vector<1x8x128xf32>
    tpu.vector_store %arg19[%c8_80, %c0_81, %c0_82], %147 {strides = array<i32>} : memref<25x8x128xf32, #tpu.memory_space<vmem>>, vector<1x8x128xf32>,
    %148 = arith.andi %113, %18 : vector<8x128xi1>
    %149 = arith.ori %148, %14 : vector<8x128xi1>
    %150 = arith.extui %149 : vector<8x128xi1> to vector<8x128xi32>
    %151 = arith.sitofp %150 : vector<8x128xi32> to vector<8x128xf32>
    %152 = vector.shape_cast %151 : vector<8x128xf32> to vector<1x8x128xf32>
    %cst_83 = arith.constant dense<0.000000e+00> : vector<8x128xf32>
    %153 = vector.multi_reduction <add>, %152, %cst_83 [0] : vector<1x8x128xf32> to vector<8x128xf32>
    %c9 = arith.constant 9 : index
    %c0_84 = arith.constant 0 : index
    %c0_85 = arith.constant 0 : index
    %154 = vector.load %arg19[%c9, %c0_84, %c0_85] : memref<25x8x128xf32, #tpu.memory_space<vmem>>, vector<1x8x128xf32>
    %155 = vector.shape_cast %154 : vector<1x8x128xf32> to vector<8x128xf32>
    %156 = arith.addf %155, %153 : vector<8x128xf32>
    %c9_86 = arith.constant 9 : index
    %c0_87 = arith.constant 0 : index
    %c0_88 = arith.constant 0 : index
    %157 = vector.load %arg19[%c9_86, %c0_87, %c0_88] : memref<25x8x128xf32, #tpu.memory_space<vmem>>, vector<1x8x128xf32>
    %158 = vector.shape_cast %157 : vector<1x8x128xf32> to vector<8x128xf32>
    %159 = vector.shape_cast %156 : vector<8x128xf32> to vector<1x8x128xf32>
    tpu.vector_store %arg19[%c9_86, %c0_87, %c0_88], %159 {strides = array<i32>} : memref<25x8x128xf32, #tpu.memory_space<vmem>>, vector<1x8x128xf32>,
    %c0_89 = arith.constant 0 : index
    %c0_90 = arith.constant 0 : index
    %160 = vector.load %arg7[%c0_89, %c0_90] : memref<8x128xf32, #tpu.memory_space<vmem>>, vector<8x128xf32>
    %c0_91 = arith.constant 0 : index
    %c0_92 = arith.constant 0 : index
    %161 = vector.load %arg8[%c0_91, %c0_92] : memref<8x128xf32, #tpu.memory_space<vmem>>, vector<8x128xf32>
    %c0_93 = arith.constant 0 : index
    %c0_94 = arith.constant 0 : index
    %162 = vector.load %arg9[%c0_93, %c0_94] : memref<8x128xf32, #tpu.memory_space<vmem>>, vector<8x128xf32>
    %c0_95 = arith.constant 0 : index
    %c0_96 = arith.constant 0 : index
    %163 = vector.load %arg10[%c0_95, %c0_96] : memref<8x128xf32, #tpu.memory_space<vmem>>, vector<8x128xf32>
    %164 = arith.subf %160, %11 : vector<8x128xf32>
    %165 = math.absf %164 : vector<8x128xf32>
    %cst_97 = arith.constant 2.000000e+00 : f32
    %166 = vector.broadcast %cst_97 : f32 to vector<8x128xf32>
    %167 = arith.mulf %166, %163 : vector<8x128xf32>
    %cst_98 = arith.constant 1.000000e+00 : f32
    %168 = vector.broadcast %cst_98 : f32 to vector<8x128xf32>
    %169 = arith.addf %168, %161 : vector<8x128xf32>
    %170 = arith.mulf %167, %169 : vector<8x128xf32>
    %171 = math.log %161 : vector<8x128xf32>
    %cst_99 = arith.constant 5.000000e-01 : f32
    %172 = vector.broadcast %cst_99 : f32 to vector<8x128xf32>
    %173 = arith.mulf %172, %171 : vector<8x128xf32>
    %cst_100 = arith.constant 0.572364926 : f32
    %174 = vector.broadcast %cst_100 : f32 to vector<8x128xf32>
    %175 = arith.subf %174, %173 : vector<8x128xf32>
    %176 = math.log %170 : vector<8x128xf32>
    %177 = arith.mulf %162, %176 : vector<8x128xf32>
    %178 = arith.subf %175, %177 : vector<8x128xf32>
    %cst_101 = arith.constant 5.000000e-01 : f32
    %179 = vector.broadcast %cst_101 : f32 to vector<8x128xf32>
    %180 = arith.addf %162, %179 : vector<8x128xf32>
    %181 = arith.mulf %161, %164 : vector<8x128xf32>
    %182 = arith.mulf %181, %164 : vector<8x128xf32>
    %183 = arith.addf %182, %170 : vector<8x128xf32>
    %184 = math.log %183 : vector<8x128xf32>
    %185 = arith.mulf %180, %184 : vector<8x128xf32>
    %186 = arith.addf %178, %185 : vector<8x128xf32>
    %cst_102 = arith.constant 2.000000e+00 : f32
    %187 = vector.broadcast %cst_102 : f32 to vector<8x128xf32>
    %188 = arith.addf %162, %187 : vector<8x128xf32>
    %cst_103 = arith.constant 5.000000e-01 : f32
    %189 = vector.broadcast %cst_103 : f32 to vector<8x128xf32>
    %190 = arith.addf %188, %189 : vector<8x128xf32>
    %191 = arith.mulf %188, %190 : vector<8x128xf32>
    %cst_104 = arith.constant 1.000000e+00 : f32
    %192 = vector.broadcast %cst_104 : f32 to vector<8x128xf32>
    %193 = arith.divf %192, %191 : vector<8x128xf32>
    %194 = arith.mulf %188, %188 : vector<8x128xf32>
    %195 = arith.mulf %188, %190 : vector<8x128xf32>
    %196 = arith.addf %194, %195 : vector<8x128xf32>
    %197 = arith.mulf %190, %190 : vector<8x128xf32>
    %198 = arith.addf %196, %197 : vector<8x128xf32>
    %cst_105 = arith.constant 5.000000e-01 : f32
    %199 = vector.broadcast %cst_105 : f32 to vector<8x128xf32>
    %200 = arith.mulf %199, %198 : vector<8x128xf32>
    %201 = arith.mulf %193, %193 : vector<8x128xf32>
    %202 = arith.mulf %201, %193 : vector<8x128xf32>
    %203 = arith.mulf %200, %202 : vector<8x128xf32>
    %cst_106 = arith.constant 5.000000e-01 : f32
    %204 = vector.broadcast %cst_106 : f32 to vector<8x128xf32>
    %205 = arith.subf %188, %204 : vector<8x128xf32>
    %206 = math.log %188 : vector<8x128xf32>
    %207 = arith.mulf %205, %206 : vector<8x128xf32>
    %208 = math.log %190 : vector<8x128xf32>
    %209 = arith.mulf %188, %208 : vector<8x128xf32>
    %210 = arith.subf %207, %209 : vector<8x128xf32>
    %cst_107 = arith.constant 5.000000e-01 : f32
    %211 = vector.broadcast %cst_107 : f32 to vector<8x128xf32>
    %212 = arith.addf %210, %211 : vector<8x128xf32>
    %cst_108 = arith.constant 0.0416666679 : f32
    %213 = vector.broadcast %cst_108 : f32 to vector<8x128xf32>
    %214 = arith.mulf %193, %213 : vector<8x128xf32>
    %215 = arith.addf %212, %214 : vector<8x128xf32>
    %cst_109 = arith.constant 0.00277777785 : f32
    %216 = vector.broadcast %cst_109 : f32 to vector<8x128xf32>
    %217 = arith.mulf %203, %216 : vector<8x128xf32>
    %218 = arith.subf %215, %217 : vector<8x128xf32>
    %cst_110 = arith.constant 5.000000e-01 : f32
    %219 = vector.broadcast %cst_110 : f32 to vector<8x128xf32>
    %220 = arith.addf %162, %219 : vector<8x128xf32>
    %cst_111 = arith.constant 1.500000e+00 : f32
    %221 = vector.broadcast %cst_111 : f32 to vector<8x128xf32>
    %222 = arith.addf %162, %221 : vector<8x128xf32>
    %223 = arith.mulf %220, %222 : vector<8x128xf32>
    %224 = math.log %223 : vector<8x128xf32>
    %225 = arith.addf %218, %224 : vector<8x128xf32>
    %cst_112 = arith.constant 1.000000e+00 : f32
    %226 = vector.broadcast %cst_112 : f32 to vector<8x128xf32>
    %227 = arith.addf %162, %226 : vector<8x128xf32>
    %228 = arith.mulf %162, %227 : vector<8x128xf32>
    %229 = math.log %228 : vector<8x128xf32>
    %230 = arith.subf %225, %229 : vector<8x128xf32>
    %231 = arith.addf %186, %230 : vector<8x128xf32>
    %cst_113 = arith.constant 0.000000e+00 : f32
    %232 = vector.broadcast %cst_113 : f32 to vector<8x128xf32>
    %233 = arith.select %14, %231, %232 : vector<8x128xi1>, vector<8x128xf32>
    %234 = vector.shape_cast %233 : vector<8x128xf32> to vector<1x8x128xf32>
    %cst_114 = arith.constant dense<0.000000e+00> : vector<8x128xf32>
    %235 = vector.multi_reduction <add>, %234, %cst_114 [0] : vector<1x8x128xf32> to vector<8x128xf32>
    %c10 = arith.constant 10 : index
    %c0_115 = arith.constant 0 : index
    %c0_116 = arith.constant 0 : index
    %236 = vector.load %arg19[%c10, %c0_115, %c0_116] : memref<25x8x128xf32, #tpu.memory_space<vmem>>, vector<1x8x128xf32>
    %237 = vector.shape_cast %236 : vector<1x8x128xf32> to vector<8x128xf32>
    %238 = arith.addf %237, %235 : vector<8x128xf32>
    %c10_117 = arith.constant 10 : index
    %c0_118 = arith.constant 0 : index
    %c0_119 = arith.constant 0 : index
    %239 = vector.load %arg19[%c10_117, %c0_118, %c0_119] : memref<25x8x128xf32, #tpu.memory_space<vmem>>, vector<1x8x128xf32>
    %240 = vector.shape_cast %239 : vector<1x8x128xf32> to vector<8x128xf32>
    %241 = vector.shape_cast %238 : vector<8x128xf32> to vector<1x8x128xf32>
    tpu.vector_store %arg19[%c10_117, %c0_118, %c0_119], %241 {strides = array<i32>} : memref<25x8x128xf32, #tpu.memory_space<vmem>>, vector<1x8x128xf32>,
    %cst_120 = arith.constant 2.000000e+00 : f32
    %242 = vector.broadcast %cst_120 : f32 to vector<8x128xf32>
    %243 = arith.mulf %242, %161 : vector<8x128xf32>
    %244 = arith.addf %243, %162 : vector<8x128xf32>
    %245 = arith.mulf %165, %244 : vector<8x128xf32>
    %cst_121 = arith.constant 0.000000e+00 : f32
    %246 = vector.broadcast %cst_121 : f32 to vector<8x128xf32>
    %247 = arith.select %14, %245, %246 : vector<8x128xi1>, vector<8x128xf32>
    %248 = vector.shape_cast %247 : vector<8x128xf32> to vector<1x8x128xf32>
    %cst_122 = arith.constant dense<0.000000e+00> : vector<8x128xf32>
    %249 = vector.multi_reduction <add>, %248, %cst_122 [0] : vector<1x8x128xf32> to vector<8x128xf32>
    %c11 = arith.constant 11 : index
    %c0_123 = arith.constant 0 : index
    %c0_124 = arith.constant 0 : index
    %250 = vector.load %arg19[%c11, %c0_123, %c0_124] : memref<25x8x128xf32, #tpu.memory_space<vmem>>, vector<1x8x128xf32>
    %251 = vector.shape_cast %250 : vector<1x8x128xf32> to vector<8x128xf32>
    %252 = arith.addf %251, %249 : vector<8x128xf32>
    %c11_125 = arith.constant 11 : index
    %c0_126 = arith.constant 0 : index
    %c0_127 = arith.constant 0 : index
    %253 = vector.load %arg19[%c11_125, %c0_126, %c0_127] : memref<25x8x128xf32, #tpu.memory_space<vmem>>, vector<1x8x128xf32>
    %254 = vector.shape_cast %253 : vector<1x8x128xf32> to vector<8x128xf32>
    %255 = vector.shape_cast %252 : vector<8x128xf32> to vector<1x8x128xf32>
    tpu.vector_store %arg19[%c11_125, %c0_126, %c0_127], %255 {strides = array<i32>} : memref<25x8x128xf32, #tpu.memory_space<vmem>>, vector<1x8x128xf32>,
    %cst_128 = arith.constant 3.000000e+00 : f32
    %256 = vector.broadcast %cst_128 : f32 to vector<8x128xf32>
    %257 = arith.cmpf ogt, %165, %256 : vector<8x128xf32>
    %258 = arith.andi %257, %14 : vector<8x128xi1>
    %259 = arith.extui %258 : vector<8x128xi1> to vector<8x128xi32>
    %260 = arith.sitofp %259 : vector<8x128xi32> to vector<8x128xf32>
    %261 = vector.shape_cast %260 : vector<8x128xf32> to vector<1x8x128xf32>
    %cst_129 = arith.constant dense<0.000000e+00> : vector<8x128xf32>
    %262 = vector.multi_reduction <add>, %261, %cst_129 [0] : vector<1x8x128xf32> to vector<8x128xf32>
    %c12 = arith.constant 12 : index
    %c0_130 = arith.constant 0 : index
    %c0_131 = arith.constant 0 : index
    %263 = vector.load %arg19[%c12, %c0_130, %c0_131] : memref<25x8x128xf32, #tpu.memory_space<vmem>>, vector<1x8x128xf32>
    %264 = vector.shape_cast %263 : vector<1x8x128xf32> to vector<8x128xf32>
    %265 = arith.addf %264, %262 : vector<8x128xf32>
    %c12_132 = arith.constant 12 : index
    %c0_133 = arith.constant 0 : index
    %c0_134 = arith.constant 0 : index
    %266 = vector.load %arg19[%c12_132, %c0_133, %c0_134] : memref<25x8x128xf32, #tpu.memory_space<vmem>>, vector<1x8x128xf32>
    %267 = vector.shape_cast %266 : vector<1x8x128xf32> to vector<8x128xf32>
    %268 = vector.shape_cast %265 : vector<8x128xf32> to vector<1x8x128xf32>
    tpu.vector_store %arg19[%c12_132, %c0_133, %c0_134], %268 {strides = array<i32>} : memref<25x8x128xf32, #tpu.memory_space<vmem>>, vector<1x8x128xf32>,
    %cst_135 = arith.constant 0.000000e+00 : f32
    %269 = vector.broadcast %cst_135 : f32 to vector<8x128xf32>
    %270 = arith.select %14, %165, %269 : vector<8x128xi1>, vector<8x128xf32>
    %271 = vector.shape_cast %270 : vector<8x128xf32> to vector<1x8x128xf32>
    %cst_136 = arith.constant dense<0.000000e+00> : vector<8x128xf32>
    %272 = vector.multi_reduction <add>, %271, %cst_136 [0] : vector<1x8x128xf32> to vector<8x128xf32>
    %c13 = arith.constant 13 : index
    %c0_137 = arith.constant 0 : index
    %c0_138 = arith.constant 0 : index
    %273 = vector.load %arg19[%c13, %c0_137, %c0_138] : memref<25x8x128xf32, #tpu.memory_space<vmem>>, vector<1x8x128xf32>
    %274 = vector.shape_cast %273 : vector<1x8x128xf32> to vector<8x128xf32>
    %275 = arith.addf %274, %272 : vector<8x128xf32>
    %c13_139 = arith.constant 13 : index
    %c0_140 = arith.constant 0 : index
    %c0_141 = arith.constant 0 : index
    %276 = vector.load %arg19[%c13_139, %c0_140, %c0_141] : memref<25x8x128xf32, #tpu.memory_space<vmem>>, vector<1x8x128xf32>
    %277 = vector.shape_cast %276 : vector<1x8x128xf32> to vector<8x128xf32>
    %278 = vector.shape_cast %275 : vector<8x128xf32> to vector<1x8x128xf32>
    tpu.vector_store %arg19[%c13_139, %c0_140, %c0_141], %278 {strides = array<i32>} : memref<25x8x128xf32, #tpu.memory_space<vmem>>, vector<1x8x128xf32>,
    %cst_142 = arith.constant 3.000000e+00 : f32
    %279 = vector.broadcast %cst_142 : f32 to vector<8x128xf32>
    %280 = arith.cmpf ogt, %165, %279 : vector<8x128xf32>
    %281 = arith.cmpf ogt, %165, %20 : vector<8x128xf32>
    %282 = arith.andi %280, %281 : vector<8x128xi1>
    %283 = arith.andi %282, %14 : vector<8x128xi1>
    %284 = arith.extui %283 : vector<8x128xi1> to vector<8x128xi32>
    %285 = arith.sitofp %284 : vector<8x128xi32> to vector<8x128xf32>
    %286 = vector.shape_cast %285 : vector<8x128xf32> to vector<1x8x128xf32>
    %cst_143 = arith.constant dense<0.000000e+00> : vector<8x128xf32>
    %287 = vector.multi_reduction <add>, %286, %cst_143 [0] : vector<1x8x128xf32> to vector<8x128xf32>
    %c14 = arith.constant 14 : index
    %c0_144 = arith.constant 0 : index
    %c0_145 = arith.constant 0 : index
    %288 = vector.load %arg19[%c14, %c0_144, %c0_145] : memref<25x8x128xf32, #tpu.memory_space<vmem>>, vector<1x8x128xf32>
    %289 = vector.shape_cast %288 : vector<1x8x128xf32> to vector<8x128xf32>
    %290 = arith.addf %289, %287 : vector<8x128xf32>
    %c14_146 = arith.constant 14 : index
    %c0_147 = arith.constant 0 : index
    %c0_148 = arith.constant 0 : index
    %291 = vector.load %arg19[%c14_146, %c0_147, %c0_148] : memref<25x8x128xf32, #tpu.memory_space<vmem>>, vector<1x8x128xf32>
    %292 = vector.shape_cast %291 : vector<1x8x128xf32> to vector<8x128xf32>
    %293 = vector.shape_cast %290 : vector<8x128xf32> to vector<1x8x128xf32>
    tpu.vector_store %arg19[%c14_146, %c0_147, %c0_148], %293 {strides = array<i32>} : memref<25x8x128xf32, #tpu.memory_space<vmem>>, vector<1x8x128xf32>,
    %c0_149 = arith.constant 0 : index
    %c0_150 = arith.constant 0 : index
    %294 = vector.load %arg11[%c0_149, %c0_150] : memref<8x128xf32, #tpu.memory_space<vmem>>, vector<8x128xf32>
    %c0_151 = arith.constant 0 : index
    %c0_152 = arith.constant 0 : index
    %295 = vector.load %arg12[%c0_151, %c0_152] : memref<8x128xf32, #tpu.memory_space<vmem>>, vector<8x128xf32>
    %c0_153 = arith.constant 0 : index
    %c0_154 = arith.constant 0 : index
    %296 = vector.load %arg13[%c0_153, %c0_154] : memref<8x128xf32, #tpu.memory_space<vmem>>, vector<8x128xf32>
    %c0_155 = arith.constant 0 : index
    %c0_156 = arith.constant 0 : index
    %297 = vector.load %arg14[%c0_155, %c0_156] : memref<8x128xf32, #tpu.memory_space<vmem>>, vector<8x128xf32>
    %298 = arith.subf %294, %11 : vector<8x128xf32>
    %299 = math.absf %298 : vector<8x128xf32>
    %cst_157 = arith.constant 2.000000e+00 : f32
    %300 = vector.broadcast %cst_157 : f32 to vector<8x128xf32>
    %301 = arith.mulf %300, %297 : vector<8x128xf32>
    %cst_158 = arith.constant 1.000000e+00 : f32
    %302 = vector.broadcast %cst_158 : f32 to vector<8x128xf32>
    %303 = arith.addf %302, %295 : vector<8x128xf32>
    %304 = arith.mulf %301, %303 : vector<8x128xf32>
    %305 = math.log %295 : vector<8x128xf32>
    %cst_159 = arith.constant 5.000000e-01 : f32
    %306 = vector.broadcast %cst_159 : f32 to vector<8x128xf32>
    %307 = arith.mulf %306, %305 : vector<8x128xf32>
    %cst_160 = arith.constant 0.572364926 : f32
    %308 = vector.broadcast %cst_160 : f32 to vector<8x128xf32>
    %309 = arith.subf %308, %307 : vector<8x128xf32>
    %310 = math.log %304 : vector<8x128xf32>
    %311 = arith.mulf %296, %310 : vector<8x128xf32>
    %312 = arith.subf %309, %311 : vector<8x128xf32>
    %cst_161 = arith.constant 5.000000e-01 : f32
    %313 = vector.broadcast %cst_161 : f32 to vector<8x128xf32>
    %314 = arith.addf %296, %313 : vector<8x128xf32>
    %315 = arith.mulf %295, %298 : vector<8x128xf32>
    %316 = arith.mulf %315, %298 : vector<8x128xf32>
    %317 = arith.addf %316, %304 : vector<8x128xf32>
    %318 = math.log %317 : vector<8x128xf32>
    %319 = arith.mulf %314, %318 : vector<8x128xf32>
    %320 = arith.addf %312, %319 : vector<8x128xf32>
    %cst_162 = arith.constant 2.000000e+00 : f32
    %321 = vector.broadcast %cst_162 : f32 to vector<8x128xf32>
    %322 = arith.addf %296, %321 : vector<8x128xf32>
    %cst_163 = arith.constant 5.000000e-01 : f32
    %323 = vector.broadcast %cst_163 : f32 to vector<8x128xf32>
    %324 = arith.addf %322, %323 : vector<8x128xf32>
    %325 = arith.mulf %322, %324 : vector<8x128xf32>
    %cst_164 = arith.constant 1.000000e+00 : f32
    %326 = vector.broadcast %cst_164 : f32 to vector<8x128xf32>
    %327 = arith.divf %326, %325 : vector<8x128xf32>
    %328 = arith.mulf %322, %322 : vector<8x128xf32>
    %329 = arith.mulf %322, %324 : vector<8x128xf32>
    %330 = arith.addf %328, %329 : vector<8x128xf32>
    %331 = arith.mulf %324, %324 : vector<8x128xf32>
    %332 = arith.addf %330, %331 : vector<8x128xf32>
    %cst_165 = arith.constant 5.000000e-01 : f32
    %333 = vector.broadcast %cst_165 : f32 to vector<8x128xf32>
    %334 = arith.mulf %333, %332 : vector<8x128xf32>
    %335 = arith.mulf %327, %327 : vector<8x128xf32>
    %336 = arith.mulf %335, %327 : vector<8x128xf32>
    %337 = arith.mulf %334, %336 : vector<8x128xf32>
    %cst_166 = arith.constant 5.000000e-01 : f32
    %338 = vector.broadcast %cst_166 : f32 to vector<8x128xf32>
    %339 = arith.subf %322, %338 : vector<8x128xf32>
    %340 = math.log %322 : vector<8x128xf32>
    %341 = arith.mulf %339, %340 : vector<8x128xf32>
    %342 = math.log %324 : vector<8x128xf32>
    %343 = arith.mulf %322, %342 : vector<8x128xf32>
    %344 = arith.subf %341, %343 : vector<8x128xf32>
    %cst_167 = arith.constant 5.000000e-01 : f32
    %345 = vector.broadcast %cst_167 : f32 to vector<8x128xf32>
    %346 = arith.addf %344, %345 : vector<8x128xf32>
    %cst_168 = arith.constant 0.0416666679 : f32
    %347 = vector.broadcast %cst_168 : f32 to vector<8x128xf32>
    %348 = arith.mulf %327, %347 : vector<8x128xf32>
    %349 = arith.addf %346, %348 : vector<8x128xf32>
    %cst_169 = arith.constant 0.00277777785 : f32
    %350 = vector.broadcast %cst_169 : f32 to vector<8x128xf32>
    %351 = arith.mulf %337, %350 : vector<8x128xf32>
    %352 = arith.subf %349, %351 : vector<8x128xf32>
    %cst_170 = arith.constant 5.000000e-01 : f32
    %353 = vector.broadcast %cst_170 : f32 to vector<8x128xf32>
    %354 = arith.addf %296, %353 : vector<8x128xf32>
    %cst_171 = arith.constant 1.500000e+00 : f32
    %355 = vector.broadcast %cst_171 : f32 to vector<8x128xf32>
    %356 = arith.addf %296, %355 : vector<8x128xf32>
    %357 = arith.mulf %354, %356 : vector<8x128xf32>
    %358 = math.log %357 : vector<8x128xf32>
    %359 = arith.addf %352, %358 : vector<8x128xf32>
    %cst_172 = arith.constant 1.000000e+00 : f32
    %360 = vector.broadcast %cst_172 : f32 to vector<8x128xf32>
    %361 = arith.addf %296, %360 : vector<8x128xf32>
    %362 = arith.mulf %296, %361 : vector<8x128xf32>
    %363 = math.log %362 : vector<8x128xf32>
    %364 = arith.subf %359, %363 : vector<8x128xf32>
    %365 = arith.addf %320, %364 : vector<8x128xf32>
    %cst_173 = arith.constant 0.000000e+00 : f32
    %366 = vector.broadcast %cst_173 : f32 to vector<8x128xf32>
    %367 = arith.select %14, %365, %366 : vector<8x128xi1>, vector<8x128xf32>
    %368 = vector.shape_cast %367 : vector<8x128xf32> to vector<1x8x128xf32>
    %cst_174 = arith.constant dense<0.000000e+00> : vector<8x128xf32>
    %369 = vector.multi_reduction <add>, %368, %cst_174 [0] : vector<1x8x128xf32> to vector<8x128xf32>
    %c15 = arith.constant 15 : index
    %c0_175 = arith.constant 0 : index
    %c0_176 = arith.constant 0 : index
    %370 = vector.load %arg19[%c15, %c0_175, %c0_176] : memref<25x8x128xf32, #tpu.memory_space<vmem>>, vector<1x8x128xf32>
    %371 = vector.shape_cast %370 : vector<1x8x128xf32> to vector<8x128xf32>
    %372 = arith.addf %371, %369 : vector<8x128xf32>
    %c15_177 = arith.constant 15 : index
    %c0_178 = arith.constant 0 : index
    %c0_179 = arith.constant 0 : index
    %373 = vector.load %arg19[%c15_177, %c0_178, %c0_179] : memref<25x8x128xf32, #tpu.memory_space<vmem>>, vector<1x8x128xf32>
    %374 = vector.shape_cast %373 : vector<1x8x128xf32> to vector<8x128xf32>
    %375 = vector.shape_cast %372 : vector<8x128xf32> to vector<1x8x128xf32>
    tpu.vector_store %arg19[%c15_177, %c0_178, %c0_179], %375 {strides = array<i32>} : memref<25x8x128xf32, #tpu.memory_space<vmem>>, vector<1x8x128xf32>,
    %cst_180 = arith.constant 2.000000e+00 : f32
    %376 = vector.broadcast %cst_180 : f32 to vector<8x128xf32>
    %377 = arith.mulf %376, %295 : vector<8x128xf32>
    %378 = arith.addf %377, %296 : vector<8x128xf32>
    %379 = arith.mulf %299, %378 : vector<8x128xf32>
    %cst_181 = arith.constant 0.000000e+00 : f32
    %380 = vector.broadcast %cst_181 : f32 to vector<8x128xf32>
    %381 = arith.select %14, %379, %380 : vector<8x128xi1>, vector<8x128xf32>
    %382 = vector.shape_cast %381 : vector<8x128xf32> to vector<1x8x128xf32>
    %cst_182 = arith.constant dense<0.000000e+00> : vector<8x128xf32>
    %383 = vector.multi_reduction <add>, %382, %cst_182 [0] : vector<1x8x128xf32> to vector<8x128xf32>
    %c16 = arith.constant 16 : index
    %c0_183 = arith.constant 0 : index
    %c0_184 = arith.constant 0 : index
    %384 = vector.load %arg19[%c16, %c0_183, %c0_184] : memref<25x8x128xf32, #tpu.memory_space<vmem>>, vector<1x8x128xf32>
    %385 = vector.shape_cast %384 : vector<1x8x128xf32> to vector<8x128xf32>
    %386 = arith.addf %385, %383 : vector<8x128xf32>
    %c16_185 = arith.constant 16 : index
    %c0_186 = arith.constant 0 : index
    %c0_187 = arith.constant 0 : index
    %387 = vector.load %arg19[%c16_185, %c0_186, %c0_187] : memref<25x8x128xf32, #tpu.memory_space<vmem>>, vector<1x8x128xf32>
    %388 = vector.shape_cast %387 : vector<1x8x128xf32> to vector<8x128xf32>
    %389 = vector.shape_cast %386 : vector<8x128xf32> to vector<1x8x128xf32>
    tpu.vector_store %arg19[%c16_185, %c0_186, %c0_187], %389 {strides = array<i32>} : memref<25x8x128xf32, #tpu.memory_space<vmem>>, vector<1x8x128xf32>,
    %cst_188 = arith.constant 3.000000e+00 : f32
    %390 = vector.broadcast %cst_188 : f32 to vector<8x128xf32>
    %391 = arith.cmpf ogt, %299, %390 : vector<8x128xf32>
    %392 = arith.andi %391, %14 : vector<8x128xi1>
    %393 = arith.extui %392 : vector<8x128xi1> to vector<8x128xi32>
    %394 = arith.sitofp %393 : vector<8x128xi32> to vector<8x128xf32>
    %395 = vector.shape_cast %394 : vector<8x128xf32> to vector<1x8x128xf32>
    %cst_189 = arith.constant dense<0.000000e+00> : vector<8x128xf32>
    %396 = vector.multi_reduction <add>, %395, %cst_189 [0] : vector<1x8x128xf32> to vector<8x128xf32>
    %c17 = arith.constant 17 : index
    %c0_190 = arith.constant 0 : index
    %c0_191 = arith.constant 0 : index
    %397 = vector.load %arg19[%c17, %c0_190, %c0_191] : memref<25x8x128xf32, #tpu.memory_space<vmem>>, vector<1x8x128xf32>
    %398 = vector.shape_cast %397 : vector<1x8x128xf32> to vector<8x128xf32>
    %399 = arith.addf %398, %396 : vector<8x128xf32>
    %c17_192 = arith.constant 17 : index
    %c0_193 = arith.constant 0 : index
    %c0_194 = arith.constant 0 : index
    %400 = vector.load %arg19[%c17_192, %c0_193, %c0_194] : memref<25x8x128xf32, #tpu.memory_space<vmem>>, vector<1x8x128xf32>
    %401 = vector.shape_cast %400 : vector<1x8x128xf32> to vector<8x128xf32>
    %402 = vector.shape_cast %399 : vector<8x128xf32> to vector<1x8x128xf32>
    tpu.vector_store %arg19[%c17_192, %c0_193, %c0_194], %402 {strides = array<i32>} : memref<25x8x128xf32, #tpu.memory_space<vmem>>, vector<1x8x128xf32>,
    %cst_195 = arith.constant 0.000000e+00 : f32
    %403 = vector.broadcast %cst_195 : f32 to vector<8x128xf32>
    %404 = arith.select %14, %299, %403 : vector<8x128xi1>, vector<8x128xf32>
    %405 = vector.shape_cast %404 : vector<8x128xf32> to vector<1x8x128xf32>
    %cst_196 = arith.constant dense<0.000000e+00> : vector<8x128xf32>
    %406 = vector.multi_reduction <add>, %405, %cst_196 [0] : vector<1x8x128xf32> to vector<8x128xf32>
    %c18 = arith.constant 18 : index
    %c0_197 = arith.constant 0 : index
    %c0_198 = arith.constant 0 : index
    %407 = vector.load %arg19[%c18, %c0_197, %c0_198] : memref<25x8x128xf32, #tpu.memory_space<vmem>>, vector<1x8x128xf32>
    %408 = vector.shape_cast %407 : vector<1x8x128xf32> to vector<8x128xf32>
    %409 = arith.addf %408, %406 : vector<8x128xf32>
    %c18_199 = arith.constant 18 : index
    %c0_200 = arith.constant 0 : index
    %c0_201 = arith.constant 0 : index
    %410 = vector.load %arg19[%c18_199, %c0_200, %c0_201] : memref<25x8x128xf32, #tpu.memory_space<vmem>>, vector<1x8x128xf32>
    %411 = vector.shape_cast %410 : vector<1x8x128xf32> to vector<8x128xf32>
    %412 = vector.shape_cast %409 : vector<8x128xf32> to vector<1x8x128xf32>
    tpu.vector_store %arg19[%c18_199, %c0_200, %c0_201], %412 {strides = array<i32>} : memref<25x8x128xf32, #tpu.memory_space<vmem>>, vector<1x8x128xf32>,
    %cst_202 = arith.constant 3.000000e+00 : f32
    %413 = vector.broadcast %cst_202 : f32 to vector<8x128xf32>
    %414 = arith.cmpf ogt, %299, %413 : vector<8x128xf32>
    %415 = arith.cmpf ogt, %299, %20 : vector<8x128xf32>
    %416 = arith.andi %414, %415 : vector<8x128xi1>
    %417 = arith.andi %416, %14 : vector<8x128xi1>
    %418 = arith.extui %417 : vector<8x128xi1> to vector<8x128xi32>
    %419 = arith.sitofp %418 : vector<8x128xi32> to vector<8x128xf32>
    %420 = vector.shape_cast %419 : vector<8x128xf32> to vector<1x8x128xf32>
    %cst_203 = arith.constant dense<0.000000e+00> : vector<8x128xf32>
    %421 = vector.multi_reduction <add>, %420, %cst_203 [0] : vector<1x8x128xf32> to vector<8x128xf32>
    %c19 = arith.constant 19 : index
    %c0_204 = arith.constant 0 : index
    %c0_205 = arith.constant 0 : index
    %422 = vector.load %arg19[%c19, %c0_204, %c0_205] : memref<25x8x128xf32, #tpu.memory_space<vmem>>, vector<1x8x128xf32>
    %423 = vector.shape_cast %422 : vector<1x8x128xf32> to vector<8x128xf32>
    %424 = arith.addf %423, %421 : vector<8x128xf32>
    %c19_206 = arith.constant 19 : index
    %c0_207 = arith.constant 0 : index
    %c0_208 = arith.constant 0 : index
    %425 = vector.load %arg19[%c19_206, %c0_207, %c0_208] : memref<25x8x128xf32, #tpu.memory_space<vmem>>, vector<1x8x128xf32>
    %426 = vector.shape_cast %425 : vector<1x8x128xf32> to vector<8x128xf32>
    %427 = vector.shape_cast %424 : vector<8x128xf32> to vector<1x8x128xf32>
    tpu.vector_store %arg19[%c19_206, %c0_207, %c0_208], %427 {strides = array<i32>} : memref<25x8x128xf32, #tpu.memory_space<vmem>>, vector<1x8x128xf32>,
    %c0_209 = arith.constant 0 : index
    %c0_210 = arith.constant 0 : index
    %428 = vector.load %arg15[%c0_209, %c0_210] : memref<8x128xf32, #tpu.memory_space<vmem>>, vector<8x128xf32>
    %c0_211 = arith.constant 0 : index
    %c0_212 = arith.constant 0 : index
    %429 = vector.load %arg16[%c0_211, %c0_212] : memref<8x128xf32, #tpu.memory_space<vmem>>, vector<8x128xf32>
    %c0_213 = arith.constant 0 : index
    %c0_214 = arith.constant 0 : index
    %430 = vector.load %arg17[%c0_213, %c0_214] : memref<8x128xf32, #tpu.memory_space<vmem>>, vector<8x128xf32>
    %c0_215 = arith.constant 0 : index
    %c0_216 = arith.constant 0 : index
    %431 = vector.load %arg18[%c0_215, %c0_216] : memref<8x128xf32, #tpu.memory_space<vmem>>, vector<8x128xf32>
    %432 = arith.subf %428, %11 : vector<8x128xf32>
    %433 = math.absf %432 : vector<8x128xf32>
    %cst_217 = arith.constant 2.000000e+00 : f32
    %434 = vector.broadcast %cst_217 : f32 to vector<8x128xf32>
    %435 = arith.mulf %434, %431 : vector<8x128xf32>
    %cst_218 = arith.constant 1.000000e+00 : f32
    %436 = vector.broadcast %cst_218 : f32 to vector<8x128xf32>
    %437 = arith.addf %436, %429 : vector<8x128xf32>
    %438 = arith.mulf %435, %437 : vector<8x128xf32>
    %439 = math.log %429 : vector<8x128xf32>
    %cst_219 = arith.constant 5.000000e-01 : f32
    %440 = vector.broadcast %cst_219 : f32 to vector<8x128xf32>
    %441 = arith.mulf %440, %439 : vector<8x128xf32>
    %cst_220 = arith.constant 0.572364926 : f32
    %442 = vector.broadcast %cst_220 : f32 to vector<8x128xf32>
    %443 = arith.subf %442, %441 : vector<8x128xf32>
    %444 = math.log %438 : vector<8x128xf32>
    %445 = arith.mulf %430, %444 : vector<8x128xf32>
    %446 = arith.subf %443, %445 : vector<8x128xf32>
    %cst_221 = arith.constant 5.000000e-01 : f32
    %447 = vector.broadcast %cst_221 : f32 to vector<8x128xf32>
    %448 = arith.addf %430, %447 : vector<8x128xf32>
    %449 = arith.mulf %429, %432 : vector<8x128xf32>
    %450 = arith.mulf %449, %432 : vector<8x128xf32>
    %451 = arith.addf %450, %438 : vector<8x128xf32>
    %452 = math.log %451 : vector<8x128xf32>
    %453 = arith.mulf %448, %452 : vector<8x128xf32>
    %454 = arith.addf %446, %453 : vector<8x128xf32>
    %cst_222 = arith.constant 2.000000e+00 : f32
    %455 = vector.broadcast %cst_222 : f32 to vector<8x128xf32>
    %456 = arith.addf %430, %455 : vector<8x128xf32>
    %cst_223 = arith.constant 5.000000e-01 : f32
    %457 = vector.broadcast %cst_223 : f32 to vector<8x128xf32>
    %458 = arith.addf %456, %457 : vector<8x128xf32>
    %459 = arith.mulf %456, %458 : vector<8x128xf32>
    %cst_224 = arith.constant 1.000000e+00 : f32
    %460 = vector.broadcast %cst_224 : f32 to vector<8x128xf32>
    %461 = arith.divf %460, %459 : vector<8x128xf32>
    %462 = arith.mulf %456, %456 : vector<8x128xf32>
    %463 = arith.mulf %456, %458 : vector<8x128xf32>
    %464 = arith.addf %462, %463 : vector<8x128xf32>
    %465 = arith.mulf %458, %458 : vector<8x128xf32>
    %466 = arith.addf %464, %465 : vector<8x128xf32>
    %cst_225 = arith.constant 5.000000e-01 : f32
    %467 = vector.broadcast %cst_225 : f32 to vector<8x128xf32>
    %468 = arith.mulf %467, %466 : vector<8x128xf32>
    %469 = arith.mulf %461, %461 : vector<8x128xf32>
    %470 = arith.mulf %469, %461 : vector<8x128xf32>
    %471 = arith.mulf %468, %470 : vector<8x128xf32>
    %cst_226 = arith.constant 5.000000e-01 : f32
    %472 = vector.broadcast %cst_226 : f32 to vector<8x128xf32>
    %473 = arith.subf %456, %472 : vector<8x128xf32>
    %474 = math.log %456 : vector<8x128xf32>
    %475 = arith.mulf %473, %474 : vector<8x128xf32>
    %476 = math.log %458 : vector<8x128xf32>
    %477 = arith.mulf %456, %476 : vector<8x128xf32>
    %478 = arith.subf %475, %477 : vector<8x128xf32>
    %cst_227 = arith.constant 5.000000e-01 : f32
    %479 = vector.broadcast %cst_227 : f32 to vector<8x128xf32>
    %480 = arith.addf %478, %479 : vector<8x128xf32>
    %cst_228 = arith.constant 0.0416666679 : f32
    %481 = vector.broadcast %cst_228 : f32 to vector<8x128xf32>
    %482 = arith.mulf %461, %481 : vector<8x128xf32>
    %483 = arith.addf %480, %482 : vector<8x128xf32>
    %cst_229 = arith.constant 0.00277777785 : f32
    %484 = vector.broadcast %cst_229 : f32 to vector<8x128xf32>
    %485 = arith.mulf %471, %484 : vector<8x128xf32>
    %486 = arith.subf %483, %485 : vector<8x128xf32>
    %cst_230 = arith.constant 5.000000e-01 : f32
    %487 = vector.broadcast %cst_230 : f32 to vector<8x128xf32>
    %488 = arith.addf %430, %487 : vector<8x128xf32>
    %cst_231 = arith.constant 1.500000e+00 : f32
    %489 = vector.broadcast %cst_231 : f32 to vector<8x128xf32>
    %490 = arith.addf %430, %489 : vector<8x128xf32>
    %491 = arith.mulf %488, %490 : vector<8x128xf32>
    %492 = math.log %491 : vector<8x128xf32>
    %493 = arith.addf %486, %492 : vector<8x128xf32>
    %cst_232 = arith.constant 1.000000e+00 : f32
    %494 = vector.broadcast %cst_232 : f32 to vector<8x128xf32>
    %495 = arith.addf %430, %494 : vector<8x128xf32>
    %496 = arith.mulf %430, %495 : vector<8x128xf32>
    %497 = math.log %496 : vector<8x128xf32>
    %498 = arith.subf %493, %497 : vector<8x128xf32>
    %499 = arith.addf %454, %498 : vector<8x128xf32>
    %cst_233 = arith.constant 0.000000e+00 : f32
    %500 = vector.broadcast %cst_233 : f32 to vector<8x128xf32>
    %501 = arith.select %14, %499, %500 : vector<8x128xi1>, vector<8x128xf32>
    %502 = vector.shape_cast %501 : vector<8x128xf32> to vector<1x8x128xf32>
    %cst_234 = arith.constant dense<0.000000e+00> : vector<8x128xf32>
    %503 = vector.multi_reduction <add>, %502, %cst_234 [0] : vector<1x8x128xf32> to vector<8x128xf32>
    %c20 = arith.constant 20 : index
    %c0_235 = arith.constant 0 : index
    %c0_236 = arith.constant 0 : index
    %504 = vector.load %arg19[%c20, %c0_235, %c0_236] : memref<25x8x128xf32, #tpu.memory_space<vmem>>, vector<1x8x128xf32>
    %505 = vector.shape_cast %504 : vector<1x8x128xf32> to vector<8x128xf32>
    %506 = arith.addf %505, %503 : vector<8x128xf32>
    %c20_237 = arith.constant 20 : index
    %c0_238 = arith.constant 0 : index
    %c0_239 = arith.constant 0 : index
    %507 = vector.load %arg19[%c20_237, %c0_238, %c0_239] : memref<25x8x128xf32, #tpu.memory_space<vmem>>, vector<1x8x128xf32>
    %508 = vector.shape_cast %507 : vector<1x8x128xf32> to vector<8x128xf32>
    %509 = vector.shape_cast %506 : vector<8x128xf32> to vector<1x8x128xf32>
    tpu.vector_store %arg19[%c20_237, %c0_238, %c0_239], %509 {strides = array<i32>} : memref<25x8x128xf32, #tpu.memory_space<vmem>>, vector<1x8x128xf32>,
    %cst_240 = arith.constant 2.000000e+00 : f32
    %510 = vector.broadcast %cst_240 : f32 to vector<8x128xf32>
    %511 = arith.mulf %510, %429 : vector<8x128xf32>
    %512 = arith.addf %511, %430 : vector<8x128xf32>
    %513 = arith.mulf %433, %512 : vector<8x128xf32>
    %cst_241 = arith.constant 0.000000e+00 : f32
    %514 = vector.broadcast %cst_241 : f32 to vector<8x128xf32>
    %515 = arith.select %14, %513, %514 : vector<8x128xi1>, vector<8x128xf32>
    %516 = vector.shape_cast %515 : vector<8x128xf32> to vector<1x8x128xf32>
    %cst_242 = arith.constant dense<0.000000e+00> : vector<8x128xf32>
    %517 = vector.multi_reduction <add>, %516, %cst_242 [0] : vector<1x8x128xf32> to vector<8x128xf32>
    %c21 = arith.constant 21 : index
    %c0_243 = arith.constant 0 : index
    %c0_244 = arith.constant 0 : index
    %518 = vector.load %arg19[%c21, %c0_243, %c0_244] : memref<25x8x128xf32, #tpu.memory_space<vmem>>, vector<1x8x128xf32>
    %519 = vector.shape_cast %518 : vector<1x8x128xf32> to vector<8x128xf32>
    %520 = arith.addf %519, %517 : vector<8x128xf32>
    %c21_245 = arith.constant 21 : index
    %c0_246 = arith.constant 0 : index
    %c0_247 = arith.constant 0 : index
    %521 = vector.load %arg19[%c21_245, %c0_246, %c0_247] : memref<25x8x128xf32, #tpu.memory_space<vmem>>, vector<1x8x128xf32>
    %522 = vector.shape_cast %521 : vector<1x8x128xf32> to vector<8x128xf32>
    %523 = vector.shape_cast %520 : vector<8x128xf32> to vector<1x8x128xf32>
    tpu.vector_store %arg19[%c21_245, %c0_246, %c0_247], %523 {strides = array<i32>} : memref<25x8x128xf32, #tpu.memory_space<vmem>>, vector<1x8x128xf32>,
    %cst_248 = arith.constant 3.000000e+00 : f32
    %524 = vector.broadcast %cst_248 : f32 to vector<8x128xf32>
    %525 = arith.cmpf ogt, %433, %524 : vector<8x128xf32>
    %526 = arith.andi %525, %14 : vector<8x128xi1>
    %527 = arith.extui %526 : vector<8x128xi1> to vector<8x128xi32>
    %528 = arith.sitofp %527 : vector<8x128xi32> to vector<8x128xf32>
    %529 = vector.shape_cast %528 : vector<8x128xf32> to vector<1x8x128xf32>
    %cst_249 = arith.constant dense<0.000000e+00> : vector<8x128xf32>
    %530 = vector.multi_reduction <add>, %529, %cst_249 [0] : vector<1x8x128xf32> to vector<8x128xf32>
    %c22 = arith.constant 22 : index
    %c0_250 = arith.constant 0 : index
    %c0_251 = arith.constant 0 : index
    %531 = vector.load %arg19[%c22, %c0_250, %c0_251] : memref<25x8x128xf32, #tpu.memory_space<vmem>>, vector<1x8x128xf32>
    %532 = vector.shape_cast %531 : vector<1x8x128xf32> to vector<8x128xf32>
    %533 = arith.addf %532, %530 : vector<8x128xf32>
    %c22_252 = arith.constant 22 : index
    %c0_253 = arith.constant 0 : index
    %c0_254 = arith.constant 0 : index
    %534 = vector.load %arg19[%c22_252, %c0_253, %c0_254] : memref<25x8x128xf32, #tpu.memory_space<vmem>>, vector<1x8x128xf32>
    %535 = vector.shape_cast %534 : vector<1x8x128xf32> to vector<8x128xf32>
    %536 = vector.shape_cast %533 : vector<8x128xf32> to vector<1x8x128xf32>
    tpu.vector_store %arg19[%c22_252, %c0_253, %c0_254], %536 {strides = array<i32>} : memref<25x8x128xf32, #tpu.memory_space<vmem>>, vector<1x8x128xf32>,
    %cst_255 = arith.constant 0.000000e+00 : f32
    %537 = vector.broadcast %cst_255 : f32 to vector<8x128xf32>
    %538 = arith.select %14, %433, %537 : vector<8x128xi1>, vector<8x128xf32>
    %539 = vector.shape_cast %538 : vector<8x128xf32> to vector<1x8x128xf32>
    %cst_256 = arith.constant dense<0.000000e+00> : vector<8x128xf32>
    %540 = vector.multi_reduction <add>, %539, %cst_256 [0] : vector<1x8x128xf32> to vector<8x128xf32>
    %c23 = arith.constant 23 : index
    %c0_257 = arith.constant 0 : index
    %c0_258 = arith.constant 0 : index
    %541 = vector.load %arg19[%c23, %c0_257, %c0_258] : memref<25x8x128xf32, #tpu.memory_space<vmem>>, vector<1x8x128xf32>
    %542 = vector.shape_cast %541 : vector<1x8x128xf32> to vector<8x128xf32>
    %543 = arith.addf %542, %540 : vector<8x128xf32>
    %c23_259 = arith.constant 23 : index
    %c0_260 = arith.constant 0 : index
    %c0_261 = arith.constant 0 : index
    %544 = vector.load %arg19[%c23_259, %c0_260, %c0_261] : memref<25x8x128xf32, #tpu.memory_space<vmem>>, vector<1x8x128xf32>
    %545 = vector.shape_cast %544 : vector<1x8x128xf32> to vector<8x128xf32>
    %546 = vector.shape_cast %543 : vector<8x128xf32> to vector<1x8x128xf32>
    tpu.vector_store %arg19[%c23_259, %c0_260, %c0_261], %546 {strides = array<i32>} : memref<25x8x128xf32, #tpu.memory_space<vmem>>, vector<1x8x128xf32>,
    %cst_262 = arith.constant 3.000000e+00 : f32
    %547 = vector.broadcast %cst_262 : f32 to vector<8x128xf32>
    %548 = arith.cmpf ogt, %433, %547 : vector<8x128xf32>
    %549 = arith.cmpf ogt, %433, %20 : vector<8x128xf32>
    %550 = arith.andi %548, %549 : vector<8x128xi1>
    %551 = arith.andi %550, %14 : vector<8x128xi1>
    %552 = arith.extui %551 : vector<8x128xi1> to vector<8x128xi32>
    %553 = arith.sitofp %552 : vector<8x128xi32> to vector<8x128xf32>
    %554 = vector.shape_cast %553 : vector<8x128xf32> to vector<1x8x128xf32>
    %cst_263 = arith.constant dense<0.000000e+00> : vector<8x128xf32>
    %555 = vector.multi_reduction <add>, %554, %cst_263 [0] : vector<1x8x128xf32> to vector<8x128xf32>
    %c24 = arith.constant 24 : index
    %c0_264 = arith.constant 0 : index
    %c0_265 = arith.constant 0 : index
    %556 = vector.load %arg19[%c24, %c0_264, %c0_265] : memref<25x8x128xf32, #tpu.memory_space<vmem>>, vector<1x8x128xf32>
    %557 = vector.shape_cast %556 : vector<1x8x128xf32> to vector<8x128xf32>
    %558 = arith.addf %557, %555 : vector<8x128xf32>
    %c24_266 = arith.constant 24 : index
    %c0_267 = arith.constant 0 : index
    %c0_268 = arith.constant 0 : index
    %559 = vector.load %arg19[%c24_266, %c0_267, %c0_268] : memref<25x8x128xf32, #tpu.memory_space<vmem>>, vector<1x8x128xf32>
    %560 = vector.shape_cast %559 : vector<1x8x128xf32> to vector<8x128xf32>
    %561 = vector.shape_cast %558 : vector<8x128xf32> to vector<1x8x128xf32>
    tpu.vector_store %arg19[%c24_266, %c0_267, %c0_268], %561 {strides = array<i32>} : memref<25x8x128xf32, #tpu.memory_space<vmem>>, vector<1x8x128xf32>,
    return
  }
  func.func @transform_0(%arg0: i32, %arg1: i32) -> (i32, i32) {
    %c2_i32 = arith.constant 2 : i32
    %0 = arith.muli %c2_i32, %arg1 : i32
    %1 = arith.addi %0, %arg0 : i32
    %c1_i32 = arith.constant 1 : i32
    %2 = arith.minsi %1, %c1_i32 : i32
    %c0_i32 = arith.constant 0 : i32
    %c0_i32_0 = arith.constant 0 : i32
    return %2, %c0_i32 : i32, i32
  }
  func.func @transform_1(%arg0: i32, %arg1: i32) -> (i32, i32) {
    %c2_i32 = arith.constant 2 : i32
    %0 = arith.muli %c2_i32, %arg1 : i32
    %1 = arith.addi %0, %arg0 : i32
    %c1_i32 = arith.constant 1 : i32
    %2 = arith.minsi %1, %c1_i32 : i32
    %c0_i32 = arith.constant 0 : i32
    %c0_i32_0 = arith.constant 0 : i32
    return %2, %c0_i32 : i32, i32
  }
  func.func @transform_2(%arg0: i32, %arg1: i32) -> (i32, i32) {
    %c2_i32 = arith.constant 2 : i32
    %0 = arith.muli %c2_i32, %arg1 : i32
    %1 = arith.addi %0, %arg0 : i32
    %c1_i32 = arith.constant 1 : i32
    %2 = arith.minsi %1, %c1_i32 : i32
    %c0_i32 = arith.constant 0 : i32
    %c0_i32_0 = arith.constant 0 : i32
    return %2, %c0_i32 : i32, i32
  }
  func.func @transform_3(%arg0: i32, %arg1: i32) -> (i32, i32) {
    %c2_i32 = arith.constant 2 : i32
    %0 = arith.muli %c2_i32, %arg1 : i32
    %1 = arith.addi %0, %arg0 : i32
    %c1_i32 = arith.constant 1 : i32
    %2 = arith.minsi %1, %c1_i32 : i32
    %c0_i32 = arith.constant 0 : i32
    %c0_i32_0 = arith.constant 0 : i32
    return %2, %c0_i32 : i32, i32
  }
  func.func @transform_4(%arg0: i32, %arg1: i32) -> (i32, i32) {
    %c2_i32 = arith.constant 2 : i32
    %0 = arith.muli %c2_i32, %arg1 : i32
    %1 = arith.addi %0, %arg0 : i32
    %c1_i32 = arith.constant 1 : i32
    %2 = arith.minsi %1, %c1_i32 : i32
    %c0_i32 = arith.constant 0 : i32
    %c0_i32_0 = arith.constant 0 : i32
    return %2, %c0_i32 : i32, i32
  }
  func.func @transform_5(%arg0: i32, %arg1: i32) -> (i32, i32) {
    %c2_i32 = arith.constant 2 : i32
    %0 = arith.muli %c2_i32, %arg1 : i32
    %1 = arith.addi %0, %arg0 : i32
    %c1_i32 = arith.constant 1 : i32
    %2 = arith.minsi %1, %c1_i32 : i32
    %c0_i32 = arith.constant 0 : i32
    %c0_i32_0 = arith.constant 0 : i32
    return %2, %c0_i32 : i32, i32
  }
  func.func @transform_6(%arg0: i32, %arg1: i32) -> (i32, i32) {
    %c2_i32 = arith.constant 2 : i32
    %0 = arith.muli %c2_i32, %arg1 : i32
    %1 = arith.addi %0, %arg0 : i32
    %c1_i32 = arith.constant 1 : i32
    %2 = arith.minsi %1, %c1_i32 : i32
    %c0_i32 = arith.constant 0 : i32
    %c0_i32_0 = arith.constant 0 : i32
    return %2, %c0_i32 : i32, i32
  }
  func.func @transform_7(%arg0: i32, %arg1: i32) -> (i32, i32) {
    %c2_i32 = arith.constant 2 : i32
    %0 = arith.muli %c2_i32, %arg1 : i32
    %1 = arith.addi %0, %arg0 : i32
    %c1_i32 = arith.constant 1 : i32
    %2 = arith.minsi %1, %c1_i32 : i32
    %c0_i32 = arith.constant 0 : i32
    %c0_i32_0 = arith.constant 0 : i32
    return %2, %c0_i32 : i32, i32
  }
  func.func @transform_8(%arg0: i32, %arg1: i32) -> (i32, i32) {
    %c2_i32 = arith.constant 2 : i32
    %0 = arith.muli %c2_i32, %arg1 : i32
    %1 = arith.addi %0, %arg0 : i32
    %c1_i32 = arith.constant 1 : i32
    %2 = arith.minsi %1, %c1_i32 : i32
    %c0_i32 = arith.constant 0 : i32
    %c0_i32_0 = arith.constant 0 : i32
    return %2, %c0_i32 : i32, i32
  }
  func.func @transform_9(%arg0: i32, %arg1: i32) -> (i32, i32) {
    %c2_i32 = arith.constant 2 : i32
    %0 = arith.muli %c2_i32, %arg1 : i32
    %1 = arith.addi %0, %arg0 : i32
    %c1_i32 = arith.constant 1 : i32
    %2 = arith.minsi %1, %c1_i32 : i32
    %c0_i32 = arith.constant 0 : i32
    %c0_i32_0 = arith.constant 0 : i32
    return %2, %c0_i32 : i32, i32
  }
  func.func @transform_10(%arg0: i32, %arg1: i32) -> (i32, i32) {
    %c2_i32 = arith.constant 2 : i32
    %0 = arith.muli %c2_i32, %arg1 : i32
    %1 = arith.addi %0, %arg0 : i32
    %c1_i32 = arith.constant 1 : i32
    %2 = arith.minsi %1, %c1_i32 : i32
    %c0_i32 = arith.constant 0 : i32
    %c0_i32_0 = arith.constant 0 : i32
    return %2, %c0_i32 : i32, i32
  }
  func.func @transform_11(%arg0: i32, %arg1: i32) -> (i32, i32) {
    %c2_i32 = arith.constant 2 : i32
    %0 = arith.muli %c2_i32, %arg1 : i32
    %1 = arith.addi %0, %arg0 : i32
    %c1_i32 = arith.constant 1 : i32
    %2 = arith.minsi %1, %c1_i32 : i32
    %c0_i32 = arith.constant 0 : i32
    %c0_i32_0 = arith.constant 0 : i32
    return %2, %c0_i32 : i32, i32
  }
  func.func @transform_12(%arg0: i32, %arg1: i32) -> (i32, i32) {
    %c2_i32 = arith.constant 2 : i32
    %0 = arith.muli %c2_i32, %arg1 : i32
    %1 = arith.addi %0, %arg0 : i32
    %c1_i32 = arith.constant 1 : i32
    %2 = arith.minsi %1, %c1_i32 : i32
    %c0_i32 = arith.constant 0 : i32
    %c0_i32_0 = arith.constant 0 : i32
    return %2, %c0_i32 : i32, i32
  }
  func.func @transform_13(%arg0: i32, %arg1: i32) -> (i32, i32) {
    %c2_i32 = arith.constant 2 : i32
    %0 = arith.muli %c2_i32, %arg1 : i32
    %1 = arith.addi %0, %arg0 : i32
    %c1_i32 = arith.constant 1 : i32
    %2 = arith.minsi %1, %c1_i32 : i32
    %c0_i32 = arith.constant 0 : i32
    %c0_i32_0 = arith.constant 0 : i32
    return %2, %c0_i32 : i32, i32
  }
  func.func @transform_14(%arg0: i32, %arg1: i32) -> (i32, i32) {
    %c2_i32 = arith.constant 2 : i32
    %0 = arith.muli %c2_i32, %arg1 : i32
    %1 = arith.addi %0, %arg0 : i32
    %c1_i32 = arith.constant 1 : i32
    %2 = arith.minsi %1, %c1_i32 : i32
    %c0_i32 = arith.constant 0 : i32
    %c0_i32_0 = arith.constant 0 : i32
    return %2, %c0_i32 : i32, i32
  }
  func.func @transform_15(%arg0: i32, %arg1: i32) -> (i32, i32) {
    %c2_i32 = arith.constant 2 : i32
    %0 = arith.muli %c2_i32, %arg1 : i32
    %1 = arith.addi %0, %arg0 : i32
    %c1_i32 = arith.constant 1 : i32
    %2 = arith.minsi %1, %c1_i32 : i32
    %c0_i32 = arith.constant 0 : i32
    %c0_i32_0 = arith.constant 0 : i32
    return %2, %c0_i32 : i32, i32
  }
  func.func @transform_16(%arg0: i32, %arg1: i32) -> (i32, i32) {
    %c2_i32 = arith.constant 2 : i32
    %0 = arith.muli %c2_i32, %arg1 : i32
    %1 = arith.addi %0, %arg0 : i32
    %c1_i32 = arith.constant 1 : i32
    %2 = arith.minsi %1, %c1_i32 : i32
    %c0_i32 = arith.constant 0 : i32
    %c0_i32_0 = arith.constant 0 : i32
    return %2, %c0_i32 : i32, i32
  }
  func.func @transform_17(%arg0: i32, %arg1: i32) -> (i32, i32, i32) {
    %c0_i32 = arith.constant 0 : i32
    %c0_i32_0 = arith.constant 0 : i32
    %c0_i32_1 = arith.constant 0 : i32
    return %arg0, %c0_i32, %c0_i32_0 : i32, i32, i32
  }
}

</mosaic_0001>

<bundles_post_ra>
// kernel: tpu_custom_call.1
= control target key start
LH: loop header
LB: loop body
LE: loop exit
PB: predicated region body
PF: predicated region fallthrough
CT: control target
= control target key end

     0   :  { %s4047_s0 = inlined_call_operand.hbm [shape: f32[16,128], index: 0, kind: input, shape index: {}]   ;;  %s4048_s1 = inlined_call_operand.hbm [shape: f32[16,128], index: 1, kind: input, shape index: {}]   ;;  %s4049_s2 = inlined_call_operand.hbm [shape: f32[16,128], index: 2, kind: input, shape index: {}]   ;;  %s4050_s3 = inlined_call_operand.hbm [shape: f32[16,128], index: 3, kind: input, shape index: {}]   ;;  %s4051_s4 = inlined_call_operand.hbm [shape: f32[16,128], index: 4, kind: input, shape index: {}]   ;;  %s4052_s5 = inlined_call_operand.vmem [shape: f32[16,128], index: 5, kind: input, shape index: {}]   ;;  %s4053_s6 = inlined_call_operand.hbm [shape: f32[16,128], index: 6, kind: input, shape index: {}]   ;;  %s4054_s7 = inlined_call_operand.hbm [shape: f32[16,128], index: 7, kind: input, shape index: {}]   ;;  %s4055_s8 = inlined_call_operand.hbm [shape: f32[16,128], index: 8, kind: input, shape index: {}]   ;;  %s4056_s9 = inlined_call_operand.vmem [shape: f32[16,128], index: 9, kind: input, shape index: {}]   ;;  %s4057_s10 = inlined_call_operand.hbm [shape: f32[16,128], index: 10, kind: input, shape index: {}]   ;;  %s4058_s11 = inlined_call_operand.hbm [shape: f32[16,128], index: 11, kind: input, shape index: {}]   ;;  %s4059_s12 = inlined_call_operand.hbm [shape: f32[16,128], index: 12, kind: input, shape index: {}]   ;;  %s4060_s13 = inlined_call_operand.vmem [shape: f32[16,128], index: 13, kind: input, shape index: {}]   ;;  %s4061_s14 = inlined_call_operand.hbm [shape: f32[16,128], index: 14, kind: input, shape index: {}]   ;;  %s4062_s15 = inlined_call_operand.hbm [shape: f32[16,128], index: 15, kind: input, shape index: {}]   ;;  %s4063_s16 = inlined_call_operand.hbm [shape: f32[16,128], index: 16, kind: input, shape index: {}]   ;;  %s4064_s17 = inlined_call_operand.hbm [shape: f32[50,8,128], index: 17, kind: output, shape index: {}]  }
   0x1   :  { %4084 = sst [smem:[#allocation46_spill]] %s4047_s0 }
   0x2   :  { %4085 = sst [smem:[#allocation47_spill]] %s4048_s1 }
   0x3   :  { %4086 = sst [smem:[#allocation48_spill]] %s4050_s3 }
   0x4   :  { %4087 = sst [smem:[#allocation49_spill]] %s4052_s5 }
   0x5   :  { %4088 = sst [smem:[#allocation50_spill]] %s4053_s6 }
   0x6   :  { %4089 = sst [smem:[#allocation51_spill]] %s4056_s9 }
   0x7   :  { %4090 = sst [smem:[#allocation52_spill]] %s4060_s13 }
   0x8   :  { %4091 = sst [smem:[#allocation53_spill]] %s4062_s15 }
   0x9   :  { %4092 = sst [smem:[#allocation54_spill]] %s4063_s16 }
   0xa   :  { %4093 = sst [smem:[#allocation55_spill]] %s4064_s17 }
   0xb   :  { %22 = vsyncpa [#allocation3], 0 }
   0xc   :  { %24 = vsyncpa [#allocation3 + $0x1], 0 }
   0xd   :  { %25 = vsyncpa [#allocation6], 0 }
   0xe   :  { %27 = vsyncpa [#allocation6 + $0x1], 0 }
   0xf   :  { %28 = vsyncpa [#allocation9], 0 }
  0x10   :  { %30 = vsyncpa [#allocation9 + $0x1], 0 }
  0x11   :  { %31 = vsyncpa [#allocation12], 0 }
  0x12   :  { %33 = vsyncpa [#allocation12 + $0x1], 0 }
  0x13   :  { %34 = vsyncpa [#allocation15], 0 }
  0x14   :  { %36 = vsyncpa [#allocation15 + $0x1], 0 }
  0x15   :  { %37 = vsyncpa [#allocation18], 0 }
  0x16   :  { %39 = vsyncpa [#allocation18 + $0x1], 0 }
  0x17   :  { %40 = vsyncpa [#allocation21], 0 }
  0x18   :  { %42 = vsyncpa [#allocation21 + $0x1], 0 }
  0x19   :  { %43 = vsyncpa [#allocation24], 0 }
  0x1a   :  { %45 = vsyncpa [#allocation24 + $0x1], 0 }
  0x1b   :  { %46 = vsyncpa [#allocation4], 0 }
  0x1c   :  { %48 = vsyncpa [#allocation4 + $0x1], 0  ;;  %s3188_s24 = smov 0   ;;  %s3190_s25 = smov 0  }
  0x1d   :  { %s3192_s26 = smov 0   ;;  %s3194_s27 = smov 0  }
  0x1e   :  { %s3196_s28 = smov 0   ;;  %s3198_s29 = smov 0  }
  0x1f   :  { %s3200_s0 = smov 0   ;;  %s3202_s30 = smov 0  }
  0x20   :  { %s3204_s18 = smov 0  }
  0x21 LB: > { %4094 = sst [smem:[#allocation35_spill]] %s3045_s24  ;;  %s3232_s19 = sadd.s32 4294967295, %s3077_s18   ;;  %s3077_s18 = sphi %s3204_s18, %s54_s18   ;;  %s3073_s30 = sphi %s3202_s30, %s4157_s30   ;;  %s3069_s0 = sphi %s3200_s0, %s4156_s0   ;;  %s3065_s29 = sphi %s3198_s29, %s4160_s29   ;;  %s3061_s28 = sphi %s3196_s28, %s4154_s28   ;;  %s3057_s27 = sphi %s3194_s27, %s4153_s27   ;;  %s3053_s26 = sphi %s3192_s26, %s4152_s26   ;;  %s3049_s25 = sphi %s3190_s25, %s4159_s25   ;;  %s3045_s24 = sphi %s3188_s24, %s4158_s24  }
  0x22   : > { %4095 = sst [smem:[#allocation36_spill]] %s3053_s26  ;;  %s2258_s1 = sadd.s32 4294967294, %s3077_s18  }
  0x23   : > { %4096 = sst [smem:[#allocation37_spill]] %s3061_s28  ;;  %s66_s20 = sadd.s32 1, %s3073_s30 }
  0x24   : > { %4097 = sst [smem:[#allocation38_spill]] %s3065_s29  ;;  %p72_p0 = scmp.lt.s32.totalorder %s3073_s30, 1 }
  0x25   : > { %4098 = sst [smem:[#allocation39_spill]] %s3069_s0  ;;  %p68_p1 = scmp.ge.s32.totalorder %s66_s20, 2 }
  0x26   : > { %4099 = sst [smem:[#allocation40_spill]] %s3073_s30  ;;  %s81_s21 = sadd.s32 1, %s3065_s29 }
  0x27   : > { %s73_s22 = scalar_select %p72_p0, %s3073_s30, 1 }
  0x28   : > { %s4162_s20 = smov (%p68_p1, %s66_s20), 0  ;;  %p88_p2 = scmp.ne.s32.totalorder %s3065_s29, %s3061_s28 }
  0x29   : > { %4100 = sst [smem:[#allocation41_spill]] %s4162_s20  ;;  %p89_p3 = scmp.eq.s32.totalorder %s3077_s18, 0 }
  0x2a   : > { %p76_p4 = scmp.lt.s32.totalorder %s4162_s20, 1  ;;  %p94_p5 = scmp.ne.s32.totalorder %s3061_s28, %s3057_s27 }
  0x2b   : > { %p3246_p6 = por %p89_p3, %p88_p2  ;;  %p95_p7 = scmp.eq.s32.totalorder %s3232_s19, 0 }
  0x2c   : > { %s77_s17 = scalar_select %p76_p4, %s4162_s20, 1 }
  0x2d   : > { %p3252_p8 = por %p95_p7, %p94_p5  ;;  %s648_s9 = ssub.s32 %s3073_s30, %s4162_s20 }
  0x2e   : > { %s78_s5 = ssub.s32 %s73_s22, %s77_s17  ;;  %p649_p9 = scmp.eq.s32.totalorder %s648_s9, 0 }
  0x2f   : > { %s4102_s13 = scalar_select %p3252_p8, 1, 0 }
  0x30   : > { %p79_p10 = scmp.eq.s32.totalorder %s78_s5, 0  ;;  %s651_s0 = sadd.s32 1, %s3053_s26 }
  0x31   : > { %s3260_s16 = scalar_select %p649_p9, %s3053_s26, %s651_s0  }
  0x32   : > { %s3263_s15 = scalar_select %p79_p10, %s3065_s29, %s81_s21  }
  0x33   : > { %4103 = sst [smem:[#allocation42_spill]] %s3260_s16  ;;  %p661_p11 = scmp.ne.s32.totalorder %s3053_s26, %s3049_s25 }
  0x34   : > { %4104 = sst [smem:[#allocation43_spill]] %s3263_s15  ;;  %p662_p12 = scmp.eq.s32.totalorder %s3232_s19, 1 }
  0x35   : > { %p667_p13 = scmp.ne.s32.totalorder %s3049_s25, %s3045_s24  ;;  %p668_p0 = scmp.eq.s32.totalorder %s2258_s1, 1 }
  0x36   : > { %p3270_p1 = por %p662_p12, %p661_p11  ;;  %p4078_p3 = scmp.ge.s32.totalorder %s3077_s18, 2 }
  0x37   : > { %p3274_p2 = por %p668_p0, %p667_p13  ;;  %s3282_s5 = sand.u32 (!%p4078_p3), 1, %s3065_s29  }
  0x38   : > { %s4105_s27 = scalar_select %p3270_p1, 1, 0 }
  0x39   : > { %s4107_s28 = scalar_select %p3274_p2, 1, 0 }
  0x3a   : > { %4106 = sst [smem:[#allocation44_spill]] %s4105_s27  ;;  %684 = sbr.rel (%p4078_p3) target bundleno = 417 (0x1a1), region = 16 }
  0x3b   : > { %4108 = sst [smem:[#allocation45_spill]] %s4107_s28  ;;  %s3284_s9 = sshll.u32 (!%p4078_p3), %s73_s22, 7 }
  0x3c   : > { %s3287_s17 = sshll.u32 (!%p4078_p3), %s3282_s5, 3  ;;  %s3290_s0 = sand.u32 (!%p4078_p3), 1, %s3077_s18  }
  0x3d   : > { %s4109_s20 = sld [smem:[#allocation47_spill]] (!%p4078_p3)  ;;  %s714_s15 = scalar_lea.vmem (!%p4078_p3), [#allocation5], %s3287_s17 }
  0x3e   : > { %s725_s29 = sshll.u32 (!%p4078_p3), %s714_s15, 4  ;;  %s726_s29 = int_to_ptr.vmem [resolvable:$true] %s725_s29 }
  0x43   : > { %s3296_s30 = scalar_lea.hbm %s4109_s20, %s3284_s9  ;;  %s2555_s1 = scalar_lea.hbm %s4109_s20, 256 }
  0x44   : > { %s2551_s16 = scalar_lea.hbm %s3296_s30, 128  ;;  %p2556_p9 = scmp.lt.u32.totalorder %s3296_s30, %s4109_s20 }
  0x45   : > { %p2552_p4 = scmp.ne.s32.totalorder %s3296_s30, %s2551_s16  ;;  %p2557_p10 = scmp.lt.u32.totalorder %s2555_s1, %s2551_s16 }
  0x46   : > { %p2559_p12 = scmp.lt.u32.totalorder %s2551_s16, %s3296_s30 }
  0x47   : > { %p2553_p5 = pnand %p2552_p4, %p3246_p6  ;;  %p2558_p11 = por %p2557_p10, %p2556_p9 }
  0x49   : > { %p2554_p7 = pneg %p2553_p5  ;;  %p2560_p13 = por %p2559_p12, %p2558_p11 }
  0x4b   : > { %p2561_p0 = pnand %p2560_p13, %p2554_p7 }
  0x4d   : > { %2564 = shalt.err (!%p2561_p0)
}
  0x4e   : > { %s2565_s15 = scalar_lea.vmem %s726_s29, 128  ;;  %s3079_s22 = smov [#allocation5]  }
  0x4f   : > { %p2566_p3 = scmp.ne.s32.totalorder %s726_s29, %s2565_s15  ;;  %s2569_s27 = sshll.u32 %s3079_s22, 4  ;;  %s2570_s27 = int_to_ptr.vmem [resolvable:$false] %s2569_s27 }
  0x50   : > { %s2571_s26 = scalar_lea.vmem %s2570_s27, 256  ;;  %p2572_p2 = scmp.lt.s32.totalorder %s726_s29, %s2570_s27 }
  0x51   : > { %p2567_p4 = pnand %p2566_p3, %p3246_p6  ;;  %p2573_p1 = scmp.lt.s32.totalorder %s2571_s26, %s2565_s15 }
  0x53   : > { %p2568_p5 = pneg %p2567_p4  ;;  %p2574_p8 = por %p2573_p1, %p2572_p2 }
  0x55   : > { %p2575_p9 = pnand %p2574_p8, %p2568_p5 }
  0x57   : > { %2578 = shalt.err (!%p2575_p9)
}
  0x58   : > { %s4110_s16 = scalar_lea.sflag [#allocation6], %s3290_s0  ;;  %s4111_s3 = sld [smem:[#allocation48_spill]] }
  0x59   : > { %2387 = dma.hbm_to_vmem [thread:$0]  (%p3246_p6), %s3296_s30, 128, %s726_s29, %s4110_s16  }
  0x5a   : > { %s758_s27 = scalar_lea.vmem [#allocation8], %s3287_s17 }
  0x5b   : > { %s769_s1 = sshll.u32 %s758_s27, 4  ;;  %s770_s1 = int_to_ptr.vmem [resolvable:$true] %s769_s1 }
  0x5e   : > { %s3323_s22 = scalar_lea.hbm %s4111_s3, %s3284_s9  ;;  %s2583_s30 = scalar_lea.hbm %s4111_s3, 256 }
  0x5f   : > { %s2579_s15 = scalar_lea.hbm %s3323_s22, 128  ;;  %p2584_p3 = scmp.lt.u32.totalorder %s3323_s22, %s4111_s3 }
  0x60   : > { %p2580_p8 = scmp.ne.s32.totalorder %s3323_s22, %s2579_s15  ;;  %p2585_p7 = scmp.lt.u32.totalorder %s2583_s30, %s2579_s15 }
  0x61   : > { %p2587_p11 = scmp.lt.u32.totalorder %s2579_s15, %s3323_s22 }
  0x62   : > { %p2581_p1 = pnand %p2580_p8, %p3246_p6  ;;  %p2586_p10 = por %p2585_p7, %p2584_p3 }
  0x64   : > { %p2582_p2 = pneg %p2581_p1  ;;  %p2588_p12 = por %p2587_p11, %p2586_p10 }
  0x66   : > { %p2589_p13 = pnand %p2588_p12, %p2582_p2 }
  0x68   : > { %2592 = shalt.err (!%p2589_p13)
}
  0x69   : > { %s2593_s28 = scalar_lea.vmem %s770_s1, 128  ;;  %s3080_s27 = smov [#allocation8]  }
  0x6a   : > { %p2594_p0 = scmp.ne.s32.totalorder %s770_s1, %s2593_s28  ;;  %s2597_s21 = sshll.u32 %s3080_s27, 4  ;;  %s2598_s21 = int_to_ptr.vmem [resolvable:$false] %s2597_s21 }
  0x6b   : > { %s2599_s26 = scalar_lea.vmem %s2598_s21, 256  ;;  %p2600_p9 = scmp.lt.s32.totalorder %s770_s1, %s2598_s21 }
  0x6c   : > { %p2595_p4 = pnand %p2594_p0, %p3246_p6  ;;  %p2601_p8 = scmp.lt.s32.totalorder %s2599_s26, %s2593_s28 }
  0x6e   : > { %p2596_p5 = pneg %p2595_p4  ;;  %p2602_p1 = por %p2601_p8, %p2600_p9 }
  0x70   : > { %p2603_p3 = pnand %p2602_p1, %p2596_p5 }
  0x72   : > { %2606 = shalt.err (!%p2603_p3)
}
  0x73   : > { %s4112_s15 = scalar_lea.sflag [#allocation9], %s3290_s0  ;;  %s4113_s6 = sld [smem:[#allocation50_spill]] }
  0x74   : > { %2389 = dma.hbm_to_vmem [thread:$0]  (%p3246_p6), %s3323_s22, 128, %s770_s1, %s4112_s15  }
  0x75   : > { %s817_s21 = scalar_lea.vmem [#allocation11], %s3287_s17 }
  0x76   : > { %s828_s24 = sshll.u32 %s817_s21, 4  ;;  %s829_s24 = int_to_ptr.vmem [resolvable:$true] %s828_s24 }
  0x79   : > { %s3350_s16 = scalar_lea.hbm %s4113_s6, %s3284_s9  ;;  %s2611_s1 = scalar_lea.hbm %s4113_s6, 256 }
  0x7a   : > { %s2607_s27 = scalar_lea.hbm %s3350_s16, 128  ;;  %p2612_p11 = scmp.lt.u32.totalorder %s3350_s16, %s4113_s6 }
  0x7b   : > { %p2608_p2 = scmp.ne.s32.totalorder %s3350_s16, %s2607_s27  ;;  %p2613_p12 = scmp.lt.u32.totalorder %s2611_s1, %s2607_s27 }
  0x7c   : > { %p2615_p0 = scmp.lt.u32.totalorder %s2607_s27, %s3350_s16 }
  0x7d   : > { %p2609_p7 = pnand %p2608_p2, %p3246_p6  ;;  %p2614_p13 = por %p2613_p12, %p2612_p11 }
  0x7f   : > { %p2610_p10 = pneg %p2609_p7  ;;  %p2616_p4 = por %p2615_p0, %p2614_p13 }
  0x81   : > { %p2617_p5 = pnand %p2616_p4, %p2610_p10 }
  0x83   : > { %2620 = shalt.err (!%p2617_p5)
}
  0x84   : > { %s2621_s30 = scalar_lea.vmem %s829_s24, 128  ;;  %s3081_s21 = smov [#allocation11]  }
  0x85   : > { %p2622_p9 = scmp.ne.s32.totalorder %s829_s24, %s2621_s30  ;;  %s2625_s28 = sshll.u32 %s3081_s21, 4  ;;  %s2626_s28 = int_to_ptr.vmem [resolvable:$false] %s2625_s28 }
  0x86   : > { %s2627_s26 = scalar_lea.vmem %s2626_s28, 256  ;;  %p2628_p3 = scmp.lt.s32.totalorder %s829_s24, %s2626_s28 }
  0x87   : > { %p2623_p8 = pnand %p2622_p9, %p3246_p6  ;;  %p2629_p2 = scmp.lt.s32.totalorder %s2627_s26, %s2621_s30 }
  0x89   : > { %p2624_p1 = pneg %p2623_p8  ;;  %p2630_p7 = por %p2629_p2, %p2628_p3 }
  0x8b   : > { %p2631_p11 = pnand %p2630_p7, %p2624_p1 }
  0x8d   : > { %2634 = shalt.err (!%p2631_p11)
}
  0x8e   : > { %s4114_s27 = scalar_lea.sflag [#allocation12], %s3290_s0  ;;  %s3377_s15 = scalar_lea.hbm %s4055_s8, %s3284_s9 }
  0x8f   : > { %2391 = dma.hbm_to_vmem [thread:$0]  (%p3246_p6), %s3350_s16, 128, %s829_s24, %s4114_s27  }
  0x90   : > { %s861_s28 = scalar_lea.vmem [#allocation14], %s3287_s17  ;;  %s2635_s21 = scalar_lea.hbm %s3377_s15, 128 }
  0x91   : > { %s872_s29 = sshll.u32 %s861_s28, 4  ;;  %p2636_p10 = scmp.ne.s32.totalorder %s3377_s15, %s2635_s21  ;;  %s873_s29 = int_to_ptr.vmem [resolvable:$true] %s872_s29 }
  0x92   : > { %s2639_s24 = scalar_lea.hbm %s4055_s8, 256  ;;  %p2640_p0 = scmp.lt.u32.totalorder %s3377_s15, %s4055_s8 }
  0x93   : > { %p2637_p12 = pnand %p2636_p10, %p3246_p6  ;;  %p2641_p4 = scmp.lt.u32.totalorder %s2639_s24, %s2635_s21 }
  0x94   : > { %p2643_p9 = scmp.lt.u32.totalorder %s2635_s21, %s3377_s15 }
  0x95   : > { %p2638_p13 = pneg %p2637_p12  ;;  %p2642_p5 = por %p2641_p4, %p2640_p0 }
  0x97   : > { %p2644_p8 = por %p2643_p9, %p2642_p5 }
  0x99   : > { %p2645_p1 = pnand %p2644_p8, %p2638_p13 }
  0x9b   : > { %2648 = shalt.err (!%p2645_p1)
}
  0x9c   : > { %s2649_s1 = scalar_lea.vmem %s873_s29, 128  ;;  %s3082_s28 = smov [#allocation14]  }
  0x9d   : > { %p2650_p3 = scmp.ne.s32.totalorder %s873_s29, %s2649_s1  ;;  %s2653_s30 = sshll.u32 %s3082_s28, 4  ;;  %s2654_s30 = int_to_ptr.vmem [resolvable:$false] %s2653_s30 }
  0x9e   : > { %s2655_s26 = scalar_lea.vmem %s2654_s30, 256  ;;  %p2656_p11 = scmp.lt.s32.totalorder %s873_s29, %s2654_s30 }
  0x9f   : > { %p2651_p2 = pnand %p2650_p3, %p3246_p6  ;;  %p2657_p10 = scmp.lt.s32.totalorder %s2655_s26, %s2649_s1 }
  0xa1   : > { %p2652_p7 = pneg %p2651_p2  ;;  %p2658_p12 = por %p2657_p10, %p2656_p11 }
  0xa3   : > { %p2659_p0 = pnand %p2658_p12, %p2652_p7 }
  0xa5   : > { %2662 = shalt.err (!%p2659_p0)
}
  0xa6   : > { %s4115_s21 = scalar_lea.sflag [#allocation15], %s3290_s0  ;;  %s3404_s27 = scalar_lea.hbm %s4058_s11, %s3284_s9 }
  0xa7   : > { %2393 = dma.hbm_to_vmem [thread:$0]  (%p3246_p6), %s3377_s15, 128, %s873_s29, %s4115_s21  }
  0xa8   : > { %s920_s30 = scalar_lea.vmem [#allocation17], %s3287_s17  ;;  %s2663_s28 = scalar_lea.hbm %s3404_s27, 128 }
  0xa9   : > { %s931_s22 = sshll.u32 %s920_s30, 4  ;;  %p2664_p13 = scmp.ne.s32.totalorder %s3404_s27, %s2663_s28  ;;  %s932_s22 = int_to_ptr.vmem [resolvable:$true] %s931_s22 }
  0xaa   : > { %s2667_s29 = scalar_lea.hbm %s4058_s11, 256  ;;  %p2668_p9 = scmp.lt.u32.totalorder %s3404_s27, %s4058_s11 }
  0xab   : > { %p2665_p4 = pnand %p2664_p13, %p3246_p6  ;;  %p2669_p8 = scmp.lt.u32.totalorder %s2667_s29, %s2663_s28 }
  0xac   : > { %p2671_p3 = scmp.lt.u32.totalorder %s2663_s28, %s3404_s27 }
  0xad   : > { %p2666_p5 = pneg %p2665_p4  ;;  %p2670_p1 = por %p2669_p8, %p2668_p9 }
  0xaf   : > { %p2672_p2 = por %p2671_p3, %p2670_p1 }
  0xb1   : > { %p2673_p7 = pnand %p2672_p2, %p2666_p5 }
  0xb3   : > { %2676 = shalt.err (!%p2673_p7)
}
  0xb4   : > { %s2677_s24 = scalar_lea.vmem %s932_s22, 128  ;;  %s3083_s30 = smov [#allocation17]  }
  0xb5   : > { %p2678_p11 = scmp.ne.s32.totalorder %s932_s22, %s2677_s24  ;;  %s2681_s1 = sshll.u32 %s3083_s30, 4  ;;  %s2682_s1 = int_to_ptr.vmem [resolvable:$false] %s2681_s1 }
  0xb6   : > { %s2683_s26 = scalar_lea.vmem %s2682_s1, 256  ;;  %p2684_p0 = scmp.lt.s32.totalorder %s932_s22, %s2682_s1 }
  0xb7   : > { %p2679_p10 = pnand %p2678_p11, %p3246_p6  ;;  %p2685_p13 = scmp.lt.s32.totalorder %s2683_s26, %s2677_s24 }
  0xb9   : > { %p2680_p12 = pneg %p2679_p10  ;;  %p2686_p4 = por %p2685_p13, %p2684_p0 }
  0xbb   : > { %p2687_p8 = pnand %p2686_p4, %p2680_p12 }
  0xbd   : > { %2690 = shalt.err (!%p2687_p8)
}
  0xbe   : > { %s4116_s28 = scalar_lea.sflag [#allocation18], %s3290_s0  ;;  %s3431_s21 = scalar_lea.hbm %s4061_s14, %s3284_s9 }
  0xbf   : > { %2395 = dma.hbm_to_vmem [thread:$0]  (%p3246_p6), %s3404_s27, 128, %s932_s22, %s4116_s28  }
  0xc0   : > { %s979_s1 = scalar_lea.vmem [#allocation20], %s3287_s17  ;;  %s2691_s30 = scalar_lea.hbm %s3431_s21, 128 }
  0xc1   : > { %s990_s16 = sshll.u32 %s979_s1, 4  ;;  %p2692_p5 = scmp.ne.s32.totalorder %s3431_s21, %s2691_s30  ;;  %s991_s16 = int_to_ptr.vmem [resolvable:$true] %s990_s16 }
  0xc2   : > { %s2695_s22 = scalar_lea.hbm %s4061_s14, 256  ;;  %p2696_p3 = scmp.lt.u32.totalorder %s3431_s21, %s4061_s14 }
  0xc3   : > { %p2693_p9 = pnand %p2692_p5, %p3246_p6  ;;  %p2697_p2 = scmp.lt.u32.totalorder %s2695_s22, %s2691_s30 }
  0xc4   : > { %p2699_p11 = scmp.lt.u32.totalorder %s2691_s30, %s3431_s21 }
  0xc5   : > { %p2694_p1 = pneg %p2693_p9  ;;  %p2698_p7 = por %p2697_p2, %p2696_p3 }
  0xc7   : > { %p2700_p10 = por %p2699_p11, %p2698_p7 }
  0xc9   : > { %p2701_p12 = pnand %p2700_p10, %p2694_p1 }
  0xcb   : > { %2704 = shalt.err (!%p2701_p12)
}
  0xcc   : > { %s2705_s29 = scalar_lea.vmem %s991_s16, 128  ;;  %s3084_s1 = smov [#allocation20]  }
  0xcd   : > { %p2706_p0 = scmp.ne.s32.totalorder %s991_s16, %s2705_s29  ;;  %s2709_s24 = sshll.u32 %s3084_s1, 4  ;;  %s2710_s24 = int_to_ptr.vmem [resolvable:$false] %s2709_s24 }
  0xce   : > { %s2711_s26 = scalar_lea.vmem %s2710_s24, 256  ;;  %p2712_p8 = scmp.lt.s32.totalorder %s991_s16, %s2710_s24 }
  0xcf   : > { %p2707_p13 = pnand %p2706_p0, %p3246_p6  ;;  %p2713_p5 = scmp.lt.s32.totalorder %s2711_s26, %s2705_s29 }
  0xd1   : > { %p2708_p4 = pneg %p2707_p13  ;;  %p2714_p9 = por %p2713_p5, %p2712_p8 }
  0xd3   : > { %p2715_p2 = pnand %p2714_p9, %p2708_p4 }
  0xd5   : > { %2718 = shalt.err (!%p2715_p2)
}
  0xd6   : > { %s4117_s30 = scalar_lea.sflag [#allocation21], %s3290_s0  ;;  %s4118_s28 = sld [smem:[#allocation46_spill]] }
  0xd7   : > { %2397 = dma.hbm_to_vmem [thread:$0]  (%p3246_p6), %s3431_s21, 128, %s991_s16, %s4117_s30  }
  0xd8   : > { %s692_s24 = scalar_lea.vmem [#allocation2], %s3287_s17  ;;  %s689_s26 = scalar_lea.sflag [#allocation3], %s3282_s5 }
  0xd9   : > { %s703_s29 = sshll.u32 %s692_s24, 4  ;;  %s704_s29 = int_to_ptr.vmem [resolvable:$true] %s703_s29 }
  0xdc   : > { %s4119_s15 = smov %s4118_s28  ;;  %s3458_s1 = scalar_lea.hbm %s4118_s28, %s3284_s9 }
  0xdd   : > { %s2719_s3 = scalar_lea.hbm %s3458_s1, 128  ;;  %s2723_s16 = scalar_lea.hbm %s4119_s15, 256 }
  0xde   : > { %p2720_p1 = scmp.ne.s32.totalorder %s3458_s1, %s2719_s3  ;;  %p2724_p11 = scmp.lt.u32.totalorder %s3458_s1, %s4119_s15 }
  0xdf   : > { %p2725_p10 = scmp.lt.u32.totalorder %s2723_s16, %s2719_s3  ;;  %p2727_p0 = scmp.lt.u32.totalorder %s2719_s3, %s3458_s1 }
  0xe0   : > { %p2721_p3 = pnand %p2720_p1, %p3246_p6 }
  0xe1   : > { %p2726_p12 = por %p2725_p10, %p2724_p11 }
  0xe2   : > { %p2722_p7 = pneg %p2721_p3 }
  0xe3   : > { %p2728_p13 = por %p2727_p0, %p2726_p12 }
  0xe5   : > { %p2729_p4 = pnand %p2728_p13, %p2722_p7 }
  0xe7   : > { %2732 = shalt.err (!%p2729_p4)
}
  0xe8   : > { %s2733_s22 = scalar_lea.vmem %s704_s29, 128  ;;  %s3085_s28 = smov [#allocation2]  }
  0xe9   : > { %p2734_p8 = scmp.ne.s32.totalorder %s704_s29, %s2733_s22  ;;  %s2737_s24 = sshll.u32 %s3085_s28, 4  ;;  %s2738_s24 = int_to_ptr.vmem [resolvable:$false] %s2737_s24 }
  0xea   : > { %s2739_s6 = scalar_lea.vmem %s2738_s24, 256  ;;  %p2740_p2 = scmp.lt.s32.totalorder %s704_s29, %s2738_s24 }
  0xeb   : > { %p2735_p5 = pnand %p2734_p8, %p3246_p6  ;;  %p2741_p1 = scmp.lt.s32.totalorder %s2739_s6, %s2733_s22 }
  0xed   : > { %p2736_p9 = pneg %p2735_p5  ;;  %p2742_p3 = por %p2741_p1, %p2740_p2 }
  0xef   : > { %p2743_p10 = pnand %p2742_p3, %p2736_p9 }
  0xf1   : > { %2746 = shalt.err (!%p2743_p10)
}
  0xf2   : > { %2386 = dma.hbm_to_vmem [thread:$0]  (%p3246_p6), %s3458_s1, 128, %s704_s29, %s689_s26  }
  0xf3   : > { %s3483_s16 = scalar_lea.hbm %s4049_s2, %s3284_s9  ;;  %s736_s30 = scalar_lea.vmem [#allocation7], %s3287_s17 }
  0xf4   : > { %s747_s27 = sshll.u32 %s736_s30, 4  ;;  %s2747_s22 = scalar_lea.hbm %s3483_s16, 128  ;;  %s748_s27 = int_to_ptr.vmem [resolvable:$true] %s747_s27 }
  0xf5   : > { %p2748_p7 = scmp.ne.s32.totalorder %s3483_s16, %s2747_s22  ;;  %s2751_s1 = scalar_lea.hbm %s4049_s2, 256 }
  0xf6   : > { %p2752_p0 = scmp.lt.u32.totalorder %s3483_s16, %s4049_s2  ;;  %p2753_p13 = scmp.lt.u32.totalorder %s2751_s1, %s2747_s22 }
  0xf7   : > { %p2749_p11 = pnand %p2748_p7, %p3246_p6  ;;  %p2755_p8 = scmp.lt.u32.totalorder %s2747_s22, %s3483_s16 }
  0xf8   : > { %p2754_p4 = por %p2753_p13, %p2752_p0 }
  0xf9   : > { %p2750_p12 = pneg %p2749_p11 }
  0xfa   : > { %p2756_p5 = por %p2755_p8, %p2754_p4 }
  0xfc   : > { %p2757_p9 = pnand %p2756_p5, %p2750_p12 }
  0xfe   : > { %2760 = shalt.err (!%p2757_p9)
}
  0xff   : > { %s2761_s6 = scalar_lea.vmem %s748_s27, 128  ;;  %s3086_s3 = smov [#allocation7]  }
 0x100   : > { %p2762_p2 = scmp.ne.s32.totalorder %s748_s27, %s2761_s6  ;;  %s2765_s21 = sshll.u32 %s3086_s3, 4  ;;  %s2766_s21 = int_to_ptr.vmem [resolvable:$false] %s2765_s21 }
 0x101   : > { %s2767_s30 = scalar_lea.vmem %s2766_s21, 256  ;;  %p2768_p10 = scmp.lt.s32.totalorder %s748_s27, %s2766_s21 }
 0x102   : > { %p2763_p1 = pnand %p2762_p2, %p3246_p6  ;;  %p2769_p7 = scmp.lt.s32.totalorder %s2767_s30, %s2761_s6 }
 0x104   : > { %p2764_p3 = pneg %p2763_p1  ;;  %p2770_p11 = por %p2769_p7, %p2768_p10 }
 0x106   : > { %p2771_p0 = pnand %p2770_p11, %p2764_p3 }
 0x108   : > { %2774 = shalt.err (!%p2771_p0)
}
 0x109   : > { %s4120_s22 = scalar_lea.sflag [#allocation6], %s3290_s0  ;;  %s3509_s1 = scalar_lea.hbm %s4051_s4, %s3284_s9 }
 0x10a   : > { %2388 = dma.hbm_to_vmem [thread:$0]  (%p3246_p6), %s3483_s16, 128, %s748_s27, %s4120_s22  }
 0x10b   : > { %s780_s29 = scalar_lea.vmem [#allocation10], %s3287_s17  ;;  %s2775_s6 = scalar_lea.hbm %s3509_s1, 128 }
 0x10c   : > { %s791_s26 = sshll.u32 %s780_s29, 4  ;;  %p2776_p12 = scmp.ne.s32.totalorder %s3509_s1, %s2775_s6  ;;  %s792_s26 = int_to_ptr.vmem [resolvable:$true] %s791_s26 }
 0x10d   : > { %s2779_s16 = scalar_lea.hbm %s4051_s4, 256  ;;  %p2780_p8 = scmp.lt.u32.totalorder %s3509_s1, %s4051_s4 }
 0x10e   : > { %p2777_p13 = pnand %p2776_p12, %p3246_p6  ;;  %p2781_p5 = scmp.lt.u32.totalorder %s2779_s16, %s2775_s6 }
 0x10f   : > { %p2783_p2 = scmp.lt.u32.totalorder %s2775_s6, %s3509_s1 }
 0x110   : > { %p2778_p4 = pneg %p2777_p13  ;;  %p2782_p9 = por %p2781_p5, %p2780_p8 }
 0x112   : > { %p2784_p1 = por %p2783_p2, %p2782_p9 }
 0x114   : > { %p2785_p3 = pnand %p2784_p1, %p2778_p4 }
 0x116   : > { %2788 = shalt.err (!%p2785_p3)
}
 0x117   : > { %s2789_s22 = scalar_lea.vmem %s792_s26, 128  ;;  %s3087_s28 = smov [#allocation10]  }
 0x118   : > { %p2790_p10 = scmp.ne.s32.totalorder %s792_s26, %s2789_s22  ;;  %s2793_s24 = sshll.u32 %s3087_s28, 4  ;;  %s2794_s24 = int_to_ptr.vmem [resolvable:$false] %s2793_s24 }
 0x119   : > { %s2795_s29 = scalar_lea.vmem %s2794_s24, 256  ;;  %p2796_p0 = scmp.lt.s32.totalorder %s792_s26, %s2794_s24 }
 0x11a   : > { %p2791_p7 = pnand %p2790_p10, %p3246_p6  ;;  %p2797_p12 = scmp.lt.s32.totalorder %s2795_s29, %s2789_s22 }
 0x11c   : > { %p2792_p11 = pneg %p2791_p7  ;;  %p2798_p13 = por %p2797_p12, %p2796_p0 }
 0x11e   : > { %p2799_p5 = pnand %p2798_p13, %p2792_p11 }
 0x120   : > { %2802 = shalt.err (!%p2799_p5)
}
 0x121   : > { %s4121_s6 = scalar_lea.sflag [#allocation9], %s3290_s0  ;;  %s3535_s16 = scalar_lea.hbm %s4054_s7, %s3284_s9 }
 0x122   : > { %2390 = dma.hbm_to_vmem [thread:$0]  (%p3246_p6), %s3509_s1, 128, %s792_s26, %s4121_s6  }
 0x123   : > { %s839_s27 = scalar_lea.vmem [#allocation13], %s3287_s17  ;;  %s2803_s22 = scalar_lea.hbm %s3535_s16, 128 }
 0x124   : > { %s850_s30 = sshll.u32 %s839_s27, 4  ;;  %p2804_p4 = scmp.ne.s32.totalorder %s3535_s16, %s2803_s22  ;;  %s851_s30 = int_to_ptr.vmem [resolvable:$true] %s850_s30 }
 0x125   : > { %s2807_s1 = scalar_lea.hbm %s4054_s7, 256  ;;  %p2808_p2 = scmp.lt.u32.totalorder %s3535_s16, %s4054_s7 }
 0x126   : > { %p2805_p8 = pnand %p2804_p4, %p3246_p6  ;;  %p2809_p1 = scmp.lt.u32.totalorder %s2807_s1, %s2803_s22 }
 0x127   : > { %p2811_p10 = scmp.lt.u32.totalorder %s2803_s22, %s3535_s16 }
 0x128   : > { %p2806_p9 = pneg %p2805_p8  ;;  %p2810_p3 = por %p2809_p1, %p2808_p2 }
 0x12a   : > { %p2812_p7 = por %p2811_p10, %p2810_p3 }
 0x12c   : > { %p2813_p11 = pnand %p2812_p7, %p2806_p9 }
 0x12e   : > { %2816 = shalt.err (!%p2813_p11)
}
 0x12f   : > { %s2817_s6 = scalar_lea.vmem %s851_s30, 128  ;;  %s3088_s3 = smov [#allocation13]  }
 0x130   : > { %p2818_p0 = scmp.ne.s32.totalorder %s851_s30, %s2817_s6  ;;  %s2821_s21 = sshll.u32 %s3088_s3, 4  ;;  %s2822_s21 = int_to_ptr.vmem [resolvable:$false] %s2821_s21 }
 0x131   : > { %s2823_s27 = scalar_lea.vmem %s2822_s21, 256  ;;  %p2824_p5 = scmp.lt.s32.totalorder %s851_s30, %s2822_s21 }
 0x132   : > { %p2819_p12 = pnand %p2818_p0, %p3246_p6  ;;  %p2825_p4 = scmp.lt.s32.totalorder %s2823_s27, %s2817_s6 }
 0x134   : > { %p2820_p13 = pneg %p2819_p12  ;;  %p2826_p8 = por %p2825_p4, %p2824_p5 }
 0x136   : > { %p2827_p1 = pnand %p2826_p8, %p2820_p13 }
 0x138   : > { %2830 = shalt.err (!%p2827_p1)
}
 0x139   : > { %s4122_s22 = scalar_lea.sflag [#allocation12], %s3290_s0  ;;  %s3561_s1 = scalar_lea.hbm %s4057_s10, %s3284_s9 }
 0x13a   : > { %2392 = dma.hbm_to_vmem [thread:$0]  (%p3246_p6), %s3535_s16, 128, %s851_s30, %s4122_s22  }
 0x13b   : > { %s898_s26 = scalar_lea.vmem [#allocation16], %s3287_s17  ;;  %s2831_s6 = scalar_lea.hbm %s3561_s1, 128 }
 0x13c   : > { %s909_s29 = sshll.u32 %s898_s26, 4  ;;  %p2832_p9 = scmp.ne.s32.totalorder %s3561_s1, %s2831_s6  ;;  %s910_s29 = int_to_ptr.vmem [resolvable:$true] %s909_s29 }
 0x13d   : > { %s2835_s16 = scalar_lea.hbm %s4057_s10, 256  ;;  %p2836_p10 = scmp.lt.u32.totalorder %s3561_s1, %s4057_s10 }
 0x13e   : > { %p2833_p2 = pnand %p2832_p9, %p3246_p6  ;;  %p2837_p7 = scmp.lt.u32.totalorder %s2835_s16, %s2831_s6 }
 0x13f   : > { %p2839_p0 = scmp.lt.u32.totalorder %s2831_s6, %s3561_s1 }
 0x140   : > { %p2834_p3 = pneg %p2833_p2  ;;  %p2838_p11 = por %p2837_p7, %p2836_p10 }
 0x142   : > { %p2840_p12 = por %p2839_p0, %p2838_p11 }
 0x144   : > { %p2841_p13 = pnand %p2840_p12, %p2834_p3 }
 0x146   : > { %2844 = shalt.err (!%p2841_p13)
}
 0x147   : > { %s2845_s22 = scalar_lea.vmem %s910_s29, 128  ;;  %s3089_s28 = smov [#allocation16]  }
 0x148   : > { %p2846_p5 = scmp.ne.s32.totalorder %s910_s29, %s2845_s22  ;;  %s2849_s24 = sshll.u32 %s3089_s28, 4  ;;  %s2850_s24 = int_to_ptr.vmem [resolvable:$false] %s2849_s24 }
 0x149   : > { %s2851_s26 = scalar_lea.vmem %s2850_s24, 256  ;;  %p2852_p1 = scmp.lt.s32.totalorder %s910_s29, %s2850_s24 }
 0x14a   : > { %p2847_p4 = pnand %p2846_p5, %p3246_p6  ;;  %p2853_p9 = scmp.lt.s32.totalorder %s2851_s26, %s2845_s22 }
 0x14c   : > { %p2848_p8 = pneg %p2847_p4  ;;  %p2854_p2 = por %p2853_p9, %p2852_p1 }
 0x14e   : > { %p2855_p7 = pnand %p2854_p2, %p2848_p8 }
 0x150   : > { %2858 = shalt.err (!%p2855_p7)
}
 0x151   : > { %s4123_s6 = scalar_lea.sflag [#allocation15], %s3290_s0  ;;  %s3587_s16 = scalar_lea.hbm %s4059_s12, %s3284_s9 }
 0x152   : > { %2394 = dma.hbm_to_vmem [thread:$0]  (%p3246_p6), %s3561_s1, 128, %s910_s29, %s4123_s6  }
 0x153   : > { %s942_s30 = scalar_lea.vmem [#allocation19], %s3287_s17  ;;  %s2859_s22 = scalar_lea.hbm %s3587_s16, 128 }
 0x154   : > { %s953_s27 = sshll.u32 %s942_s30, 4  ;;  %p2860_p3 = scmp.ne.s32.totalorder %s3587_s16, %s2859_s22  ;;  %s954_s27 = int_to_ptr.vmem [resolvable:$true] %s953_s27 }
 0x155   : > { %s2863_s1 = scalar_lea.hbm %s4059_s12, 256  ;;  %p2864_p0 = scmp.lt.u32.totalorder %s3587_s16, %s4059_s12 }
 0x156   : > { %p2861_p10 = pnand %p2860_p3, %p3246_p6  ;;  %p2865_p12 = scmp.lt.u32.totalorder %s2863_s1, %s2859_s22 }
 0x157   : > { %p2867_p5 = scmp.lt.u32.totalorder %s2859_s22, %s3587_s16 }
 0x158   : > { %p2862_p11 = pneg %p2861_p10  ;;  %p2866_p13 = por %p2865_p12, %p2864_p0 }
 0x15a   : > { %p2868_p4 = por %p2867_p5, %p2866_p13 }
 0x15c   : > { %p2869_p8 = pnand %p2868_p4, %p2862_p11 }
 0x15e   : > { %2872 = shalt.err (!%p2869_p8)
}
 0x15f   : > { %s2873_s6 = scalar_lea.vmem %s954_s27, 128  ;;  %s3090_s3 = smov [#allocation19]  }
 0x160   : > { %p2874_p1 = scmp.ne.s32.totalorder %s954_s27, %s2873_s6  ;;  %s2877_s21 = sshll.u32 %s3090_s3, 4  ;;  %s2878_s21 = int_to_ptr.vmem [resolvable:$false] %s2877_s21 }
 0x161   : > { %s2879_s30 = scalar_lea.vmem %s2878_s21, 256  ;;  %p2880_p7 = scmp.lt.s32.totalorder %s954_s27, %s2878_s21 }
 0x162   : > { %p2875_p9 = pnand %p2874_p1, %p3246_p6  ;;  %p2881_p3 = scmp.lt.s32.totalorder %s2879_s30, %s2873_s6 }
 0x164   : > { %p2876_p2 = pneg %p2875_p9  ;;  %p2882_p10 = por %p2881_p3, %p2880_p7 }
 0x166   : > { %p2883_p0 = pnand %p2882_p10, %p2876_p2 }
 0x168   : > { %2886 = shalt.err (!%p2883_p0)
}
 0x169   : > { %s4124_s22 = scalar_lea.sflag [#allocation18], %s3290_s0  ;;  %s4125_s1 = sld [smem:[#allocation53_spill]] }
 0x16a   : > { %2396 = dma.hbm_to_vmem [thread:$0]  (%p3246_p6), %s3587_s16, 128, %s954_s27, %s4124_s22  }
 0x16b   : > { %s1001_s26 = scalar_lea.vmem [#allocation22], %s3287_s17 }
 0x16c   : > { %s1012_s6 = sshll.u32 %s1001_s26, 4  ;;  %s1013_s6 = int_to_ptr.vmem [resolvable:$true] %s1012_s6 }
 0x16f   : > { %s3613_s29 = scalar_lea.hbm %s4125_s1, %s3284_s9  ;;  %s2891_s16 = scalar_lea.hbm %s4125_s1, 256 }
 0x170   : > { %s2887_s3 = scalar_lea.hbm %s3613_s29, 128  ;;  %p2892_p5 = scmp.lt.u32.totalorder %s3613_s29, %s4125_s1 }
 0x171   : > { %p2888_p11 = scmp.ne.s32.totalorder %s3613_s29, %s2887_s3  ;;  %p2893_p4 = scmp.lt.u32.totalorder %s2891_s16, %s2887_s3 }
 0x172   : > { %p2895_p1 = scmp.lt.u32.totalorder %s2887_s3, %s3613_s29 }
 0x173   : > { %p2889_p12 = pnand %p2888_p11, %p3246_p6  ;;  %p2894_p8 = por %p2893_p4, %p2892_p5 }
 0x175   : > { %p2890_p13 = pneg %p2889_p12  ;;  %p2896_p9 = por %p2895_p1, %p2894_p8 }
 0x177   : > { %p2897_p2 = pnand %p2896_p9, %p2890_p13 }
 0x179   : > { %2900 = shalt.err (!%p2897_p2)
}
 0x17a   : > { %s2901_s28 = scalar_lea.vmem %s1013_s6, 128  ;;  %s3091_s24 = smov [#allocation22]  }
 0x17b   : > { %p2902_p7 = scmp.ne.s32.totalorder %s1013_s6, %s2901_s28  ;;  %s2905_s26 = sshll.u32 %s3091_s24, 4  ;;  %s2906_s26 = int_to_ptr.vmem [resolvable:$false] %s2905_s26 }
 0x17c   : > { %s2907_s21 = scalar_lea.vmem %s2906_s26, 256  ;;  %p2908_p0 = scmp.lt.s32.totalorder %s1013_s6, %s2906_s26 }
 0x17d   : > { %p2903_p3 = pnand %p2902_p7, %p3246_p6  ;;  %p2909_p11 = scmp.lt.s32.totalorder %s2907_s21, %s2901_s28 }
 0x17f   : > { %p2904_p10 = pneg %p2903_p3  ;;  %p2910_p12 = por %p2909_p11, %p2908_p0 }
 0x181   : > { %p2911_p4 = pnand %p2910_p12, %p2904_p10 }
 0x183   : > { %2914 = shalt.err (!%p2911_p4)
}
 0x184   : > { %s4126_s3 = scalar_lea.sflag [#allocation21], %s3290_s0  ;;  %s4127_s27 = sld [smem:[#allocation54_spill]] }
 0x185   : > { %2398 = dma.hbm_to_vmem [thread:$0]  (%p3246_p6), %s3613_s29, 128, %s1013_s6, %s4126_s3  }
 0x186   : > { %s1023_s28 = scalar_lea.vmem [#allocation23], %s3287_s17  ;;  %s1020_s21 = scalar_lea.sflag [#allocation24], %s3282_s5 }
 0x187   : > { %s1034_s26 = sshll.u32 %s1023_s28, 4  ;;  %s1035_s26 = int_to_ptr.vmem [resolvable:$true] %s1034_s26 }
 0x18a   : > { %s4128_s22 = smov %s4127_s27  ;;  %s3639_s24 = scalar_lea.hbm %s4127_s27, %s3284_s9 }
 0x18b   : > { %s2915_s0 = scalar_lea.hbm %s3639_s24, 128  ;;  %s2919_s6 = scalar_lea.hbm %s4128_s22, 256 }
 0x18c   : > { %p2916_p13 = scmp.ne.s32.totalorder %s3639_s24, %s2915_s0  ;;  %p2920_p1 = scmp.lt.u32.totalorder %s3639_s24, %s4128_s22 }
 0x18d   : > { %p2921_p9 = scmp.lt.u32.totalorder %s2919_s6, %s2915_s0  ;;  %p2923_p7 = scmp.lt.u32.totalorder %s2915_s0, %s3639_s24 }
 0x18e   : > { %p2917_p5 = pnand %p2916_p13, %p3246_p6 }
 0x18f   : > { %p2922_p2 = por %p2921_p9, %p2920_p1 }
 0x190   : > { %p2918_p8 = pneg %p2917_p5 }
 0x191   : > { %p2924_p3 = por %p2923_p7, %p2922_p2 }
 0x193   : > { %p2925_p10 = pnand %p2924_p3, %p2918_p8 }
 0x195   : > { %2928 = shalt.err (!%p2925_p10)
}
 0x196   : > { %s2929_s5 = scalar_lea.vmem %s1035_s26, 128  ;;  %s3092_s17 = smov [#allocation23]  }
 0x197   : > { %p2930_p0 = scmp.ne.s32.totalorder %s1035_s26, %s2929_s5  ;;  %s2933_s30 = sshll.u32 %s3092_s17, 4  ;;  %s2934_s30 = int_to_ptr.vmem [resolvable:$false] %s2933_s30 }
 0x198   : > { %s2935_s1 = scalar_lea.vmem %s2934_s30, 256  ;;  %p2936_p4 = scmp.lt.s32.totalorder %s1035_s26, %s2934_s30 }
 0x199   : > { %p2931_p11 = pnand %p2930_p0, %p3246_p6  ;;  %p2937_p13 = scmp.lt.s32.totalorder %s2935_s1, %s2929_s5 }
 0x19b   : > { %p2932_p12 = pneg %p2931_p11  ;;  %p2938_p5 = por %p2937_p13, %p2936_p4 }
 0x19d   : > { %p2939_p1 = pnand %p2938_p5, %p2932_p12 }
 0x19f   : > { %2942 = shalt.err (!%p2939_p1)
}
 0x1a0   : > { %2399 = dma.hbm_to_vmem [thread:$0]  (%p3246_p6), %s3639_s24, 128, %s1035_s26, %s1020_s21  }
 0x1a1 PF: > { %p2289_p8 = scmp.ge.s32.totalorder %s3077_s18, 1  ;;  %p1039_p9 = scmp.lt.s32.totalorder %s3077_s18, 3 }
 0x1a3   : > { %p1040_p2 = pnand %p2289_p8, %p1039_p9 }
 0x1a4   : > { %s4129_s16 = sld [smem:[#allocation37_spill]] (!%p1040_p2)  ;;  %p4130_p7 = scmp.ne.s32.totalorder (!%p1040_p2), %s4102_s13, 0 }
 0x1a5   : > { %1043 = sbr.rel (%p1040_p2) target bundleno = 543 (0x21f), region = 88 }
 0x1aa   : > { %s3663_s27 = sand.u32 (!%p1040_p2), 1, %s4129_s16  }
 0x1ab   : > { %s3666_s28 = sshll.u32 (!%p1040_p2), %s3663_s27, 3  ;;  %s1046_s0 = scalar_lea.sflag (!%p1040_p2), [#allocation3], %s3663_s27 }
 0x1ac   : > { %s1049_s23 = scalar_lea.vmem [#allocation2], %s3666_s28 }
 0x1ad   : > { %3008 = dma.done.wait (%p4130_p7), %s1046_s0, 128  }
 0x1ae   : > { %3010 = vsyncadd (%p4130_p7), %s1046_s0, 4294967168  ;;  %s3675_s24 = sand.u32 1, %s3232_s19   ;;  %s1058_s21 = scalar_lea.vmem [#allocation5], %s3666_s28 }
 0x1af   : > { %s1055_s26 = scalar_lea.sflag [#allocation6], %s3675_s24 }
 0x1b0   : > { %3012 = dma.done.wait (%p4130_p7), %s1055_s26, 256  }
 0x1b1   : > { %3014 = vsyncadd (%p4130_p7), %s1055_s26, 4294967040  ;;  %s1067_s29 = scalar_lea.vmem [#allocation7], %s3666_s28  ;;  %s1073_s6 = scalar_lea.sflag [#allocation9], %s3675_s24 }
 0x1b2   : > { %s1076_s3 = scalar_lea.vmem [#allocation8], %s3666_s28 }
 0x1b3   : > { %3016 = dma.done.wait (%p4130_p7), %s1073_s6, 256  }
 0x1b4   : > { %3018 = vsyncadd (%p4130_p7), %s1073_s6, 4294967040  ;;  %s1085_s19 = scalar_lea.vmem [#allocation10], %s3666_s28  ;;  %s1091_s9 = scalar_lea.sflag [#allocation12], %s3675_s24 }
 0x1b5   : > { %s1094_s5 = scalar_lea.vmem [#allocation11], %s3666_s28 }
 0x1b6   : > { %3020 = dma.done.wait (%p4130_p7), %s1091_s9, 256  }
 0x1b7   : > { %3022 = vsyncadd (%p4130_p7), %s1091_s9, 4294967040  ;;  %s1109_s30 = scalar_lea.sflag [#allocation15], %s3675_s24  ;;  %s1112_s1 = scalar_lea.vmem [#allocation14], %s3666_s28 }
 0x1b8   : > { %3024 = dma.done.wait (%p4130_p7), %s1109_s30, 256  }
 0x1b9   : > { %3026 = vsyncadd (%p4130_p7), %s1109_s30, 4294967040  ;;  %s1127_s0 = scalar_lea.sflag [#allocation18], %s3675_s24 }
 0x1ba   : > { %3028 = dma.done.wait (%p4130_p7), %s1127_s0, 256  }
 0x1bb   : > { %3030 = vsyncadd (%p4130_p7), %s1127_s0, 4294967040  ;;  %s1139_s6 = scalar_lea.vmem [#allocation19], %s3666_s28  ;;  %s1145_s9 = scalar_lea.sflag [#allocation21], %s3675_s24 }
 0x1bc   : > { %s1148_s17 = scalar_lea.vmem [#allocation20], %s3666_s28 }
 0x1bd   : > { %3032 = dma.done.wait (%p4130_p7), %s1145_s9, 256  }
 0x1be   : > { %3034 = vsyncadd (%p4130_p7), %s1145_s9, 4294967040  ;;  %s1157_s30 = scalar_lea.vmem [#allocation22], %s3666_s28  ;;  %s1163_s26 = scalar_lea.sflag [#allocation24], %s3663_s27 }
 0x1bf   : > { %s1166_s16 = scalar_lea.vmem [#allocation23], %s3666_s28 }
 0x1c0   : > { %3036 = dma.done.wait (%p4130_p7), %s1163_s26, 128  }
 0x1c1   : > { %3038 = vsyncadd (%p4130_p7), %s1163_s26, 4294967168  ;;  %s4131_s0 = sld [smem:[#allocation39_spill]]  ;;  %v1431_v0 = vlaneseq  ;;  %s1303_s27 = sand.u32 1, %s3049_s25   ;;  %v3735_v4 = vld [vmem:[%s1049_s23] sm:$0xff]  ;;  %v1460_v6 = vld [vmem:[%s1076_s3] sm:$0xff]  ;;  %v3093_v14 = vmov 0.0  }
 0x1c2   : > { %s3731_s13 = smul.u32 200, %s1303_s27  ;;  %v1449_v5 = vld [vmem:[%s1067_s29] sm:$0xff]  ;;  %vm1437_vm1 = vcmp.gt.f32.partialorder %v3735_v4, 0.0  ;;  %v1461_v8 = vsub.f32 %v1460_v6, %v3735_v4  ;;  %v1439_v9 = vld [vmem:[%s1058_s21] sm:$0xff]  ;;  %s4134_s3 = sld [smem:[#allocation49_spill]]  ;;  %vm3094_vm10 = vmmov 1  }
 0x1c3   : > { %v1432_v2 = vshrl.u32 %v1431_v0, 7  ;;  %v1450_v7 = vadd.f32 1e-06, %v1449_v5  ;;  %v1474_v10 = vld [vmem:[%s1085_s19] sm:$0xff]  ;;  %vm1440_vm3 = vcmp.gt.f32.partialorder %v1439_v9, 0.5  ;;  %v1540_v22 = vld [vmem:[%s1094_s5] sm:$0xff] }
 0x1c4   : > { %v1482_v12 = vadd.f32 1e-06, %v1474_v10  ;;  %v1492_v13 = vsub.f32 1.0, %v1474_v10  ;;  %vm1503_vm4 = vcmp.gt.f32.partialorder %v1474_v10, 0.5  ;;  %v1462_v16 = vand.u32 2147483647, %v1461_v8 }
 0x1c5   : > { %2497 = vlog2.f32 %v1450_v7  ;;  %v1464_v17 = vmul.f32 0.5, %v1461_v8  ;;  %v1542_v23 = vld [vmem:[%s1112_s1] sm:$0xff]  ;;  %s3784_s19 = scalar_lea.vmem [#allocation25], %s3731_s13  ;;  %vm1504_vm11 = vmxor %vm1503_vm4, %vm3094_vm10  ;;  %s4139_s5 = scalar_lea.vmem [#allocation13], %s3666_s28  ;;  %v1546_v33 = vadd.f32 1.0, %v1540_v22  ;;  %v1607_v55 = vmul.f32 2.0, %v1540_v22 }
 0x1c6   : > { %2499 = vlog2.f32 %v1482_v12  ;;  %v1493_v21 = vadd.f32 1e-06, %v1492_v13  ;;  %vm3776_vm7 = vcmp.lt.f32.partialorder %v1462_v16, 1.0  ;;  %v2320_v26 = vadd.f32 -0.5, %v1462_v16  ;;  %v3798_v32 = vld [vmem:[%s4139_s5] sm:$0xff]  ;;  %s4141_s23 = scalar_lea.vmem [#allocation16], %s3666_s28 }
 0x1c7   : > { %s2316_s24 = sshll.u32 %s4131_s0, 3  ;;  %p1328_p6 = scmp.lt.s32.totalorder %s4131_s0, 1  ;;  %v1465_v25 = vmul.f32 %v1464_v17, %v1461_v8  ;;  %v1545_v29 = vmul.f32 2.0, %v1542_v23  ;;  %v3812_v38 = vadd.f32 0.5, %v3798_v32  ;;  %v3815_v39 = vadd.f32 2.0, %v3798_v32  ;;  %v3856_v16 = vld [vmem:[%s4141_s23] sm:$0xff] }
 0x1c8   : > { %v1433_v1 = vstv %s2316_s24  ;;  %2501 = vlog2.f32 %v1493_v21  ;;  %v1590_v40 = vadd.f32 1.5, %v3798_v32  ;;  %v1595_v45 = vadd.f32 1.0, %v3798_v32  ;;  %v1644_v17 = vld [vmem:[%s1139_s6] sm:$0xff]  ;;  %s4142_s29 = scalar_lea.vmem [#allocation17], %s3666_s28  ;;  %s4144_s28 = sld [smem:[#allocation44_spill]] }
 0x1c9   : > { %v1434_v3 = vadd.s32 %v1433_v1, %v1432_v2  ;;  %s1329_s9 = scalar_select %p1328_p6, %s4131_s0, 1  ;;  %v1467_v30 = vsel %vm3776_vm7, %v1465_v25, %v2320_v26  ;;  %2503 = vlog2.f32 %v1540_v22  ;;  %v1547_v36 = vmul.f32 %v1546_v33, %v1545_v29 }
 0x1ca   : > { %v1565_v44 = vadd.f32 0.5, %v3815_v39  ;;  %v1569_v48 = vmul.f32 %v3815_v39, %v3815_v39  ;;  %v3826_v49 = vadd.f32 -0.5, %v3815_v39  ;;  %v1591_v53 = vmul.f32 %v1590_v40, %v3812_v38  ;;  %s4145_s1 = sld [smem:[#allocation55_spill]] }
 0x1cb   : > { %vm1435_vm0 = vcmp.lt.s32.totalorder %v1434_v3, 16  ;;  %s4164_s9 = smov (!%p1328_p6, %s1329_s9), 1  ;;  %2505 = vlog2.f32 %v1547_v36  ;;  %v1596_v59 = vmul.f32 %v1595_v45, %v3798_v32  ;;  %v1608_v63 = vadd.f32 %v1607_v55, %v3798_v32 }
 0x1cc   : > { %s3747_s26 = sshll.u32 %s4164_s9, 3  ;;  %vm3750_vm2 = vmand %vm1437_vm1, %vm1435_vm0  ;;  %2507 = vlog2.f32 %v3815_v39  ;;  %v1566_v52 = vmul.f32 %v1565_v44, %v3815_v39  ;;  %v1571_v58 = vmul.f32 %v1565_v44, %v1565_v44  ;;  %s4140_s9 = sld [smem:[#allocation51_spill]]  ;;  %v1647_v26 = vmul.f32 2.0, %v1644_v17  ;;  %v1746_v17 = vld [vmem:[%s1166_s16] sm:$0xff] }
 0x1cd   : > { %s1333_s21 = scalar_lea.vmem %s4134_s3, %s3747_s26  ;;  %v2317_v15 = vsel %vm3750_vm2, 1.0, %v3093_v14  ;;  %vm3762_vm5 = vmand %vm1440_vm3, %vm1435_vm0  ;;  %v1468_v34 = vsel %vm3750_vm2, %v1467_v30, 0.0  ;;  %2509 = vlog2.f32 %v1565_v44  ;;  %s1859_s16 = sshll.u32 %s3784_s19, 4  ;;  %s3986_s16 = int_to_ptr.vmem [resolvable:$true] %s1859_s16 }
 0x1ce   : > { %v1539_v19 = vld [vmem:[%s1333_s21] sm:$0xff]  ;;  %v2323_v20 = vsel %vm3762_vm5, 1.0, %v3093_v14  ;;  %vm1505_vm6 = vmand %vm1503_vm4, %vm3762_vm5  ;;  %1448 = vst [vmem:[%s3784_s19] sm:$0xff] %v2317_v15  ;;  %v1570_v62 = vadd.f32 %v1569_v48, %v1566_v52  ;;  %v3852_v15 = vmul.f32 0.05, %v3735_v4  ;;  %s4143_s21 = sld [smem:[#allocation52_spill]]  ;;  %p4146_p10 = scmp.ne.s32.totalorder %s4144_s28, 0 }
 0x1cf   : > { %vm1513_vm8 = vmand %vm1503_vm4, %vm3750_vm2  ;;  %v2330_v27 = vsel %vm1505_vm6, 1.0, %v3093_v14  ;;  %v1543_v28 = vsub.f32 %v1539_v19, %v3735_v4  ;;  %2325 = vst [vmem:[%s3784_s19 + $0x18] sm:$0xff] %v2323_v20  ;;  %v2498_v46 = vpop.eup %2497  ;;  %v3866_v20 = vld [vmem:[%s4142_s29] sm:$0xff] }
 0x1d0   : > { %vm1514_vm9 = vmor %vm1513_vm8, %vm3762_vm5  ;;  %2332 = vst [vmem:[%s3784_s19 + $0x30] sm:$0xff] %v2330_v27  ;;  %v2500_v50 = vpop.eup %2499  ;;  %v1452_v51 = vmul.f32 0.6931472, %v2498_v46  ;;  %v1572_v23 = vadd.f32 %v1571_v58, %v1570_v62  ;;  %v1648_v27 = vadd.f32 1.0, %v3856_v16  ;;  %v1697_v62 = vadd.f32 1.0, %v3866_v20 }
 0x1d1   : > { %v2333_v31 = vsel %vm1514_vm9, 1.0, %v3093_v14  ;;  %vm1522_vm12 = vmand %vm1504_vm11, %vm3750_vm2  ;;  %v1557_v37 = vmul.f32 %v1543_v28, %v1540_v22  ;;  %2322 = vst [vmem:[%s3784_s19 + $0x10] sm:$0xff] %v1468_v34  ;;  %v1544_v43 = vand.u32 2147483647, %v1543_v28  ;;  %v1484_v54 = vmul.f32 0.6931472, %v2500_v50 }
 0x1d2   : > { %v2336_v35 = vsel %vm1522_vm12, 1.0, %v3093_v14  ;;  %vm1530_vm13 = vmand %vm1504_vm11, %vm3762_vm5  ;;  %2335 = vst [vmem:[%s3784_s19 + $0x38] sm:$0xff] %v2333_v31  ;;  %v2502_v56 = vpop.eup %2501  ;;  %v1453_v57 = vsub.f32 0.0, %v1452_v51  ;;  %s1357_s13 = scalar_lea.vmem %s4140_s9, %s3747_s26  ;;  %v3880_v31 = vadd.f32 2.0, %v3866_v20  ;;  %v1573_v40 = vmul.f32 0.5, %v1572_v23  ;;  %s3991_s9 = scalar_lea.sflag [#allocation4], %s1303_s27 }
 0x1d3   : > { %vm1531_vm14 = vmor %vm1530_vm13, %vm3750_vm2  ;;  %v1558_v42 = vmul.f32 %v1557_v37, %v1543_v28  ;;  %2338 = vst [vmem:[%s3784_s19 + $0x40] sm:$0xff] %v2336_v35  ;;  %vm1616_vm15 = vcmp.gt.f32.partialorder %v1544_v43, 3.0  ;;  %v1485_v60 = vsub.f32 0.0, %v1484_v54  ;;  %v1495_v61 = vmul.f32 0.6931472, %v2502_v56  ;;  %v2504_v0 = vpop.eup %2503  ;;  %v1641_v8 = vld [vmem:[%s1357_s13] sm:$0xff] }
 0x1d4   : > { %v2339_v41 = vsel %vm1531_vm14, 1.0, %v3093_v14  ;;  %vm1617_vm0 = vmand %vm1616_vm15, %vm3750_vm2  ;;  %v1454_v1 = vsel %vm3750_vm2, %v1453_v57, 0.0  ;;  %v1625_v3 = vsel %vm3750_vm2, %v1544_v43, 0.0  ;;  %v1549_v7 = vmul.f32 0.6931472, %v2504_v0  ;;  %s1381_s5 = scalar_lea.vmem %s4143_s21, %s3747_s26  ;;  %s3095_s13 = smov [#allocation25]  }
 0x1d5   : > { %v1559_v47 = vadd.f32 %v1558_v42, %v1547_v36  ;;  %2341 = vst [vmem:[%s3784_s19 + $0x48] sm:$0xff] %v2339_v41  ;;  %v2347_v2 = vsel %vm1617_vm0, 1.0, %v3093_v14  ;;  %v1486_v5 = vsel %vm3762_vm5, %v1485_v60, 0.0  ;;  %v1496_v6 = vsub.f32 0.0, %v1495_v61  ;;  %v2506_v10 = vpop.eup %2505  ;;  %2319 = vst [vmem:[%s3784_s19 + $0x8] sm:$0xff] %v1454_v1  ;;  %s2947_s23 = sshll.u32 %s3095_s13, 4  ;;  %s2948_s23 = int_to_ptr.vmem [resolvable:$false] %s2947_s23 }
 0x1d6   : > { %v1609_v9 = vmul.f32 %v1608_v63, %v1544_v43  ;;  %v1550_v13 = vmul.f32 0.5, %v1549_v7  ;;  %2327 = vst [vmem:[%s3784_s19 + $0x20] sm:$0xff] %v1486_v5  ;;  %v1553_v18 = vmul.f32 0.6931472, %v2506_v10  ;;  %2349 = vst [vmem:[%s3784_s19 + $0x60] sm:$0xff] %v2347_v2  ;;  %v1645_v21 = vsub.f32 %v1641_v8, %v3735_v4  ;;  %v2508_v22 = vpop.eup %2507  ;;  %s2949_s29 = scalar_lea.vmem %s2948_s23, 6400  ;;  %p2950_p12 = scmp.lt.s32.totalorder %s3986_s16, %s2948_s23 }
 0x1d7   : > { %2511 = vlog2.f32 %v1559_v47  ;;  %v1497_v12 = vsel %vm3750_vm2, %v1496_v6, 0.0  ;;  %2351 = vst [vmem:[%s3784_s19 + $0x68] sm:$0xff] %v1625_v3  ;;  %vm1631_vm1 = vcmp.gt.f32.partialorder %v1544_v43, %v3852_v15  ;;  %v2510_v24 = vpop.eup %2509  ;;  %v1579_v25 = vmul.f32 0.6931472, %v2508_v22 }
 0x1d8   : > { %2513 = vrcp.f32 %v1566_v52  ;;  %v1610_v19 = vsel %vm3750_vm2, %v1609_v9, 0.0  ;;  %2329 = vst [vmem:[%s3784_s19 + $0x28] sm:$0xff] %v1497_v12  ;;  %vm1632_vm3 = vmand %vm1616_vm15, %vm1631_vm1  ;;  %v1582_v29 = vmul.f32 0.6931472, %v2510_v24  ;;  %v1659_v30 = vmul.f32 %v1645_v21, %v3856_v16  ;;  %v1743_v9 = vld [vmem:[%s1381_s5] sm:$0xff] }
 0x1d9   : > { %2515 = vlog2.f32 %v1591_v53  ;;  %2346 = vst [vmem:[%s3784_s19 + $0x58] sm:$0xff] %v1610_v19  ;;  %vm1633_vm4 = vmand %vm1632_vm3, %vm3750_vm2  ;;  %v1551_v34 = vsub.f32 0.5723649, %v1550_v13  ;;  %v1554_v35 = vmul.f32 %v1553_v18, %v3798_v32  ;;  %v1580_v36 = vmul.f32 %v3826_v49, %v1579_v25 }
 0x1da   : > { %2517 = vlog2.f32 %v1596_v59  ;;  %v2352_v37 = vsel %vm1633_vm4, 1.0, %v3093_v14  ;;  %v1583_v42 = vmul.f32 %v1582_v29, %v3815_v39  ;;  %v1649_v45 = vmul.f32 %v1648_v27, %v1647_v26 }
 0x1db   : > { %2519 = vlog2.f32 %v3856_v16  ;;  %v1660_v46 = vmul.f32 %v1659_v30, %v1645_v21  ;;  %2354 = vst [vmem:[%s3784_s19 + $0x70] sm:$0xff] %v2352_v37  ;;  %v1667_v51 = vadd.f32 0.5, %v3880_v31  ;;  %v1555_v32 = vsub.f32 %v1551_v34, %v1554_v35 }
 0x1dc   : > { %v1584_v48 = vsub.f32 %v1580_v36, %v1583_v42  ;;  %2521 = vlog2.f32 %v1649_v45  ;;  %v3889_v49 = vadd.f32 0.5, %v3866_v20  ;;  %v1671_v56 = vmul.f32 %v3880_v31, %v3880_v31 }
 0x1dd   : > { %v1661_v53 = vadd.f32 %v1660_v46, %v1649_v45  ;;  %v1668_v55 = vmul.f32 %v1667_v51, %v3880_v31  ;;  %v1692_v59 = vadd.f32 1.5, %v3866_v20  ;;  %v1673_v1 = vmul.f32 %v1667_v51, %v1667_v51 }
 0x1de   : > { %v1585_v39 = vadd.f32 0.5, %v1584_v48  ;;  %v1709_v7 = vmul.f32 2.0, %v3856_v16  ;;  %v1698_v13 = vmul.f32 %v1697_v62, %v3866_v20  ;;  %v1744_v16 = vld [vmem:[%s1148_s17] sm:$0xff]  ;;  %v1747_v23 = vsub.f32 %v1743_v9, %v3735_v4  ;;  %s2384_s17 = smul.u32 3200, %s4131_s0  ;;  %s2943_s0 = scalar_lea.vmem %s3986_s16, 3200 }
 0x1df   : > { %2523 = vlog2.f32 %v1661_v53  ;;  %v1672_v3 = vadd.f32 %v1671_v56, %v1668_v55  ;;  %v1693_v5 = vmul.f32 %v1692_v59, %v3889_v49  ;;  %v1749_v27 = vmul.f32 2.0, %v1746_v17  ;;  %p2944_p3 = scmp.ne.s32.totalorder %s3986_s16, %s2943_s0  ;;  %p2951_p4 = scmp.lt.s32.totalorder %s2949_s29, %s2943_s0 }
 0x1e0   : > { %2525 = vrcp.f32 %v1668_v55  ;;  %v1710_v18 = vadd.f32 %v1709_v7, %v3866_v20  ;;  %v1761_v35 = vmul.f32 %v1747_v23, %v1744_v16  ;;  %s3984_s24 = scalar_lea.hbm %s4145_s1, %s2384_s17 }
 0x1e1   : > { %v2512_v28 = vpop.eup %2511  ;;  %2527 = vlog2.f32 %v3880_v31  ;;  %v1674_v22 = vadd.f32 %v1673_v1, %v1672_v3  ;;  %v1748_v1 = vand.u32 2147483647, %v1747_v23  ;;  %v1811_v3 = vmul.f32 2.0, %v1744_v16  ;;  %p2945_p0 = pnand %p2944_p3, %p4146_p10  ;;  %p2952_p13 = por %p2951_p4, %p2950_p12 }
 0x1e2   : > { %v2514_v33 = vpop.eup %2513  ;;  %v1561_v44 = vmul.f32 0.6931472, %v2512_v28  ;;  %2529 = vlog2.f32 %v1667_v51 }
 0x1e3   : > { %v1574_v41 = vmul.f32 %v2514_v33, %v2514_v33  ;;  %v2516_v43 = vpop.eup %2515  ;;  %v1586_v50 = vmul.f32 0.041666668, %v2514_v33  ;;  %2531 = vlog2.f32 %v1693_v5  ;;  %vm1820_vm10 = vcmp.gt.f32.partialorder %v1748_v1, 3.0  ;;  %p2946_p11 = pneg %p2945_p0 }
 0x1e4   : > { %v2518_v52 = vpop.eup %2517  ;;  %v1562_v57 = vmul.f32 %v1561_v44, %v3812_v38  ;;  %v1593_v58 = vmul.f32 0.6931472, %v2516_v43  ;;  %v1646_v38 = vand.u32 2147483647, %v1645_v21  ;;  %2533 = vlog2.f32 %v1698_v13  ;;  %vm1821_vm11 = vmand %vm1820_vm10, %vm3750_vm2 }
 0x1e5   : > { %v1575_v47 = vmul.f32 %v2514_v33, %v1574_v41  ;;  %v1587_v60 = vadd.f32 %v1586_v50, %v1585_v39  ;;  %v2520_v63 = vpop.eup %2519  ;;  %v1598_v0 = vmul.f32 0.6931472, %v2518_v52  ;;  %v1750_v33 = vadd.f32 1.0, %v1744_v16  ;;  %v3929_v41 = vld [vmem:[%s1157_s30] sm:$0xff]  ;;  %p2953_p5 = pnand %p2952_p13, %p2946_p11 }
 0x1e6   : > { %v1651_v6 = vmul.f32 0.6931472, %v2520_v63  ;;  %vm1718_vm5 = vcmp.gt.f32.partialorder %v1646_v38, 3.0  ;;  %v1727_v8 = vsel %vm3750_vm2, %v1646_v38, 0.0  ;;  %v1563_v10 = vadd.f32 %v1562_v57, %v1555_v32  ;;  %v2522_v24 = vpop.eup %2521 }
 0x1e7   : > { %v1576_v54 = vmul.f32 %v1575_v47, %v1573_v40  ;;  %vm1719_vm6 = vmand %vm1718_vm5, %vm3750_vm2  ;;  %vm1733_vm7 = vcmp.gt.f32.partialorder %v1646_v38, %v3852_v15  ;;  %v1711_v26 = vmul.f32 %v1710_v18, %v1646_v38  ;;  %2364 = vst [vmem:[%s3784_s19 + $0x90] sm:$0xff] %v1727_v8  ;;  %v1655_v29 = vmul.f32 0.6931472, %v2522_v24 }
 0x1e8   : > { %v2360_v19 = vsel %vm1719_vm6, 1.0, %v3093_v14  ;;  %vm1734_vm8 = vmand %vm1718_vm5, %vm1733_vm7  ;;  %v1652_v25 = vmul.f32 0.5, %v1651_v6  ;;  %v2355_v40 = vadd.f32 -0.5, %v3880_v31  ;;  %v1675_v44 = vmul.f32 0.5, %v1674_v22 }
 0x1e9   : > { %v1588_v61 = vmul.f32 0.0027777778, %v1576_v54  ;;  %vm1735_vm9 = vmand %vm1734_vm8, %vm3750_vm2  ;;  %2362 = vst [vmem:[%s3784_s19 + $0x88] sm:$0xff] %v2360_v19  ;;  %v2524_v34 = vpop.eup %2523  ;;  %v1712_v4 = vsel %vm3750_vm2, %v1711_v26, 0.0  ;;  %v1656_v47 = vmul.f32 %v1655_v29, %v3866_v20  ;;  %v1751_v50 = vmul.f32 %v1750_v33, %v1749_v27 }
 0x1ea   : > { %v2365_v30 = vsel %vm1735_vm9, 1.0, %v3093_v14  ;;  %v2526_v36 = vpop.eup %2525  ;;  %v1653_v43 = vsub.f32 0.5723649, %v1652_v25  ;;  %2359 = vst [vmem:[%s3784_s19 + $0x80] sm:$0xff] %v1712_v4  ;;  %2535 = vlog2.f32 %v1744_v16  ;;  %v1762_v32 = vmul.f32 %v1761_v35, %v1747_v23 }
 0x1eb   : > { %v1589_v2 = vsub.f32 %v1587_v60, %v1588_v61  ;;  %v2528_v42 = vpop.eup %2527  ;;  %v1676_v45 = vmul.f32 %v2526_v36, %v2526_v36  ;;  %2367 = vst [vmem:[%s3784_s19 + $0x98] sm:$0xff] %v2365_v30  ;;  %v3936_v53 = vadd.f32 2.0, %v3929_v41  ;;  %v1663_v57 = vmul.f32 0.6931472, %v2524_v34 }
 0x1ec   : > { %v2530_v46 = vpop.eup %2529  ;;  %v1681_v48 = vmul.f32 0.6931472, %v2528_v42  ;;  %2537 = vlog2.f32 %v1751_v50  ;;  %v3941_v20 = vadd.f32 0.5, %v3929_v41  ;;  %v1657_v60 = vsub.f32 %v1653_v43, %v1656_v47 }
 0x1ed   : > { %v1594_v12 = vadd.f32 %v1593_v58, %v1589_v2  ;;  %v1677_v51 = vmul.f32 %v2526_v36, %v1676_v45  ;;  %v1684_v52 = vmul.f32 0.6931472, %v2530_v46  ;;  %v1769_v56 = vadd.f32 0.5, %v3936_v53  ;;  %v2532_v59 = vpop.eup %2531 }
 0x1ee   : > { %v1682_v54 = vmul.f32 %v2355_v40, %v1681_v48  ;;  %v1688_v58 = vmul.f32 0.041666668, %v2526_v36  ;;  %v1763_v62 = vadd.f32 %v1762_v32, %v1751_v50  ;;  %2539 = vlog2.f32 %v3936_v53  ;;  %v2534_v5 = vpop.eup %2533 }
 0x1ef   : > { %v1599_v21 = vsub.f32 %v1594_v12, %v1598_v0  ;;  %v1678_v39 = vmul.f32 %v1677_v51, %v1675_v44  ;;  %v1685_v55 = vmul.f32 %v1684_v52, %v3880_v31  ;;  %v1770_v63 = vmul.f32 %v1769_v56, %v3936_v53 }
 0x1f0   : > { %v1773_v0 = vmul.f32 %v3936_v53, %v3936_v53  ;;  %v1794_v31 = vadd.f32 1.5, %v3929_v41  ;;  %v1664_v6 = vmul.f32 %v1663_v57, %v3889_v49  ;;  %v1799_v7 = vadd.f32 1.0, %v3929_v41 }
 0x1f1   : > { %v1600_v28 = vadd.f32 %v1599_v21, %v1563_v10  ;;  %v1686_v61 = vsub.f32 %v1682_v54, %v1685_v55  ;;  %v1690_v2 = vmul.f32 0.0027777778, %v1678_v39  ;;  %2541 = vrcp.f32 %v1770_v63 }
 0x1f2   : > { %2543 = vlog2.f32 %v1769_v56  ;;  %v1695_v9 = vmul.f32 0.6931472, %v2532_v59  ;;  %v1812_v10 = vadd.f32 %v1811_v3, %v3929_v41  ;;  %v1774_v13 = vadd.f32 %v1773_v0, %v1770_v63 }
 0x1f3   : > { %v1601_v37 = vsel %vm3750_vm2, %v1600_v28, 0.0  ;;  %v1687_v38 = vadd.f32 0.5, %v1686_v61  ;;  %2545 = vlog2.f32 %v1763_v62  ;;  %v1775_v17 = vmul.f32 %v1769_v56, %v1769_v56 }
 0x1f4   : > { %2344 = vst [vmem:[%s3784_s19 + $0x50] sm:$0xff] %v1601_v37  ;;  %v2536_v12 = vpop.eup %2535  ;;  %v1795_v18 = vmul.f32 %v1794_v31, %v3941_v20  ;;  %v2373_v49 = vsel %vm1821_vm11, 1.0, %v3093_v14  ;;  %v1700_v16 = vmul.f32 0.6931472, %v2534_v5  ;;  %v1813_v21 = vmul.f32 %v1812_v10, %v1748_v1 }
 0x1f5   : > { %v1689_v8 = vadd.f32 %v1688_v58, %v1687_v38  ;;  %v1800_v22 = vmul.f32 %v1799_v7, %v3929_v41  ;;  %v1829_v23 = vsel %vm3750_vm2, %v1748_v1, 0.0  ;;  %vm1835_vm12 = vcmp.gt.f32.partialorder %v1748_v1, %v3852_v15  ;;  %2375 = vst [vmem:[%s3784_s19 + $0xb0] sm:$0xff] %v2373_v49 }
 0x1f6   : > { %v1665_v24 = vadd.f32 %v1664_v6, %v1657_v60  ;;  %v1814_v26 = vsel %vm3750_vm2, %v1813_v21, 0.0  ;;  %vm1836_vm13 = vmand %vm1820_vm10, %vm1835_vm12  ;;  %v2538_v27 = vpop.eup %2537  ;;  %v1753_v28 = vmul.f32 0.6931472, %v2536_v12  ;;  %v1776_v29 = vadd.f32 %v1775_v17, %v1774_v13  ;;  %2377 = vst [vmem:[%s3784_s19 + $0xb8] sm:$0xff] %v1829_v23 }
 0x1f7   : > { %v1691_v19 = vsub.f32 %v1689_v8, %v1690_v2  ;;  %2547 = vlog2.f32 %v1795_v18  ;;  %vm1837_vm14 = vmand %vm1836_vm13, %vm3750_vm2  ;;  %v2368_v15 = vadd.f32 -0.5, %v3936_v53  ;;  %2372 = vst [vmem:[%s3784_s19 + $0xa8] sm:$0xff] %v1814_v26  ;;  %v1757_v46 = vmul.f32 0.6931472, %v2538_v27 }
 0x1f8   : > { %v2378_v33 = vsel %vm1837_vm14, 1.0, %v3093_v14  ;;  %v2540_v34 = vpop.eup %2539  ;;  %2549 = vlog2.f32 %v1800_v22  ;;  %v1754_v40 = vmul.f32 0.5, %v1753_v28  ;;  %v1777_v42 = vmul.f32 0.5, %v1776_v29 }
 0x1f9   : > { %v1696_v25 = vadd.f32 %v1695_v9, %v1691_v19  ;;  %v1783_v36 = vmul.f32 0.6931472, %v2540_v34  ;;  %2380 = vst [vmem:[%s3784_s19 + $0xc0] sm:$0xff] %v2378_v33  ;;  %v1758_v32 = vmul.f32 %v1757_v46, %v3929_v41 }
 0x1fa   : > { %v1755_v51 = vsub.f32 0.5723649, %v1754_v40 }
 0x1fb   : > { %v1701_v30 = vsub.f32 %v1696_v25, %v1700_v16  ;;  %v2542_v4 = vpop.eup %2541  ;;  %v1784_v47 = vmul.f32 %v2368_v15, %v1783_v36 }
 0x1fc   : > { %v2544_v37 = vpop.eup %2543  ;;  %v1778_v43 = vmul.f32 %v2542_v4, %v2542_v4  ;;  %v1790_v55 = vmul.f32 0.041666668, %v2542_v4  ;;  %v1759_v60 = vsub.f32 %v1755_v51, %v1758_v32 }
 0x1fd   : > { %v1702_v35 = vadd.f32 %v1701_v30, %v1665_v24  ;;  %v2546_v44 = vpop.eup %2545  ;;  %v1786_v48 = vmul.f32 0.6931472, %v2544_v37 }
 0x1fe   : > { %v1779_v14 = vmul.f32 %v2542_v4, %v1778_v43  ;;  %v1765_v54 = vmul.f32 0.6931472, %v2546_v44 }
 0x1ff   : > { %v1703_v45 = vsel %vm3750_vm2, %v1702_v35, 0.0  ;;  %v1787_v50 = vmul.f32 %v1786_v48, %v3936_v53 }
 0x200   : > { %2357 = vst [vmem:[%s3784_s19 + $0x78] sm:$0xff] %v1703_v45  ;;  %v1780_v52 = vmul.f32 %v1779_v14, %v1777_v42  ;;  %v1766_v61 = vmul.f32 %v1765_v54, %v3941_v20 }
 0x201   : > { %v1788_v39 = vsub.f32 %v1784_v47, %v1787_v50  ;;  %v2548_v56 = vpop.eup %2547 }
 0x202   : > { %v1792_v58 = vmul.f32 0.0027777778, %v1780_v52  ;;  %v2550_v59 = vpop.eup %2549  ;;  %v1797_v62 = vmul.f32 0.6931472, %v2548_v56  ;;  %v1767_v41 = vadd.f32 %v1766_v61, %v1759_v60 }
 0x203   : > { %v1789_v57 = vadd.f32 0.5, %v1788_v39  ;;  %v1802_v0 = vmul.f32 0.6931472, %v2550_v59 }
 0x205   : > { %v1791_v53 = vadd.f32 %v1790_v55, %v1789_v57 }
 0x207   : > { %v1793_v63 = vsub.f32 %v1791_v53, %v1792_v58 }
 0x209   : > { %v1798_v31 = vadd.f32 %v1797_v62, %v1793_v63 }
 0x20b   : > { %v1803_v1 = vsub.f32 %v1798_v31, %v1802_v0 }
 0x20d   : > { %v1804_v38 = vadd.f32 %v1803_v1, %v1767_v41 }
 0x20f   : > { %v1805_v2 = vsel %vm3750_vm2, %v1804_v38, 0.0 }
 0x210   : > { %2370 = vst [vmem:[%s3784_s19 + $0xa0] sm:$0xff] %v1805_v2 }
 0x211   : > { %2956 = shalt.err (!%p2953_p5)
}
 0x212   : > { %s2957_s27 = scalar_lea.hbm %s3984_s24, 3200  ;;  %s2961_s3 = scalar_lea.hbm %s4145_s1, 6400 }
 0x213   : > { %p2958_p1 = scmp.ne.s32.totalorder %s3984_s24, %s2957_s27  ;;  %p2962_p2 = scmp.lt.u32.totalorder %s3984_s24, %s4145_s1 }
 0x214   : > { %p2963_p7 = scmp.lt.u32.totalorder %s2961_s3, %s2957_s27  ;;  %p2965_p3 = scmp.lt.u32.totalorder %s2957_s27, %s3984_s24 }
 0x215   : > { %p2959_p8 = pnand %p2958_p1, %p4146_p10 }
 0x216   : > { %p2964_p6 = por %p2963_p7, %p2962_p2 }
 0x217   : > { %p2960_p9 = pneg %p2959_p8 }
 0x218   : > { %p2966_p0 = por %p2965_p3, %p2964_p6 }
 0x21a   : > { %p2967_p11 = pnand %p2966_p0, %p2960_p9 }
 0x21c   : > { %2970 = shalt.err (!%p2967_p11)
}
 0x21d   : > { %s3096_s17 = smov 128   ;;  %s3097_s30 = smov 8  }
 0x21e   : > { %2414 = dma.vmem_to_hbm [thread:$0]  (%p4146_p10), %s3986_s16, 3200, %s3984_s24, %s3991_s9, %s3096_s17, %s3096_s17, %s3097_s30  }
 0x21f PF: > { %s4147_s26 = sld [smem:[#allocation35_spill]]  ;;  %s4148_s0 = sld [smem:[#allocation45_spill]] }
 0x220   : > { %p4150_p4 = scmp.ge.s32.totalorder %s3077_s18, 2 }
 0x225   : > { %s1874_s13 = sand.u32 1, %s4147_s26   ;;  %p4149_p12 = scmp.ne.s32.totalorder %s4148_s0, 0 }
 0x226   : > { %s1875_s23 = scalar_lea.sflag [#allocation4], %s1874_s13 }
 0x227   : > { %p2417_p13 = pnand %p4150_p4, %p4149_p12 }
 0x229   : > { %3040 = dma.done.wait (!%p2417_p13), %s1875_s23, 3200  }
 0x22a   : > { %3042 = vsyncadd (!%p2417_p13), %s1875_s23, 4294964096  ;;  %s54_s18 = sadd.s32 1, %s3077_s18   ;;  %s4151_s29 = sld [smem:[#allocation36_spill]] }
 0x22b   : > { %p51_p5 = scmp.ge.s32.totalorder %s54_s18, 4   ;;  %s4152_s26 = sld [smem:[#allocation42_spill]] }
 0x22c   : > { %s4153_s27 = sld [smem:[#allocation37_spill]]  ;;  %s4154_s28 = sld [smem:[#allocation38_spill]] }
 0x22d   : > { %s4155_s16 = sld [smem:[#allocation43_spill]]  ;;  %s4156_s0 = sld [smem:[#allocation40_spill]] }
 0x22e   : > { %s4157_s30 = sld [smem:[#allocation41_spill]]  ;;  %s4158_s24 = smov %s3049_s25 }
 0x22f   :  { %53 = sbr.rel (!%p51_p5) target bundleno = 33 (0x21), region = 327 }
 0x230   : > { %s4159_s25 = smov %s4151_s29 }
 0x233   : > { %s4160_s29 = smov %s4155_s16 }
 0x236   :  { %1880 = vsyncpa [#allocation3], 1 }
 0x237   :  { %1882 = vsyncpa [#allocation3 + $0x1], 1 }
 0x238   :  { %1883 = vsyncpa [#allocation6], 1 }
 0x239   :  { %1885 = vsyncpa [#allocation6 + $0x1], 1 }
 0x23a   :  { %1886 = vsyncpa [#allocation9], 1 }
 0x23b   :  { %1888 = vsyncpa [#allocation9 + $0x1], 1 }
 0x23c   :  { %1889 = vsyncpa [#allocation12], 1 }
 0x23d   :  { %1891 = vsyncpa [#allocation12 + $0x1], 1 }
 0x23e   :  { %1892 = vsyncpa [#allocation15], 1 }
 0x23f   :  { %1894 = vsyncpa [#allocation15 + $0x1], 1 }
 0x240   :  { %1895 = vsyncpa [#allocation18], 1 }
 0x241   :  { %1897 = vsyncpa [#allocation18 + $0x1], 1 }
 0x242   :  { %1898 = vsyncpa [#allocation21], 1 }
 0x243   :  { %1900 = vsyncpa [#allocation21 + $0x1], 1 }
 0x244   :  { %1901 = vsyncpa [#allocation24], 1 }
 0x245   :  { %1903 = vsyncpa [#allocation24 + $0x1], 1 }
 0x246   :  { %1904 = vsyncpa [#allocation4], 1 }
 0x247   :  { %1906 = vsyncpa [#allocation4 + $0x1], 1 }

</bundles_post_ra>
